<compile_context>
chip_gen: v7x
topology: tpu7x:2x2x1
jax: 0.10.0
libtpu: 0.0.40
codegen_flags: <defaults>
</compile_context>

<pallas_src>
import functools

import jax
import jax.numpy as jnp
from jax import lax
from jax.experimental import pallas as pl
from jax.experimental.pallas import tpu as pltpu

_HIGHEST = lax.Precision.HIGHEST


# ---------------------------------------------------------------------------
# VMEM budgeting (counts Mosaic intermediates, not just pipeline buffers)
# ---------------------------------------------------------------------------
def _vmem_budget_bytes():
    """Returns (tile working-set budget, scoped vmem_limit_bytes).

    Conservative defaults sized for v7x (64 MiB physical VMEM per TensorCore);
    bumped up when the runtime reports the 128 MiB VMEM of v5e / v6e.
    """
    budget, limit = 40 << 20, 48 << 20
    try:
        if pltpu.get_tpu_info().vmem_capacity_bytes >= (96 << 20):
            budget, limit = 80 << 20, 100 << 20          # v5e / v6e
    except Exception:
        pass  # best-effort query; the conservative default is always safe
    return budget, limit


def _tile_working_set_bytes(rows, d, itemsize):
    # 2x double-buffered input tile + 2x double-buffered output tile (pipeline)
    # + ~2 full-tile f32 intermediates the body still materializes
    # (the a_norm (x) g outer product and the f32 residual before the store cast).
    return rows * d * (2 * itemsize + 2 * itemsize + 2 * 4)


# ---------------------------------------------------------------------------
# Fused path: one (bt, N, D) batch tile fully resident in VMEM
# ---------------------------------------------------------------------------
def _fused_kernel(alpha_ref, beta_ref, feat_ref, wt_ref, out_ref):
    f32 = jnp.float32
    n = feat_ref.shape[1]
    feat = feat_ref[...]                                         # (bt, N, D), storage dtype

    # adaptive_avg_pool1d over N; f32 accumulation without a full-tile cast.
    mean_f = jnp.sum(feat, axis=1, dtype=f32) * (1.0 / n)        # (bt, D)

    # Conv1d(D, D, 1, bias=False): g = mean_f @ W^T (W pre-transposed on host).
    g = jnp.dot(mean_f, wt_ref[...],
                preferred_element_type=f32, precision=_HIGHEST)  # (bt, D)

    # atten = bmm(feat, g): batched (N, D) @ (D, 1) contraction on the MXU.
    g_rhs = g[:, None, :]                                        # (bt, 1, D)
    if feat.dtype != f32:
        g_rhs = g_rhs.astype(feat.dtype)                         # bf16 path: keep tile uncast
    a = jnp.einsum("bnd,bkd->bnk", feat, g_rhs,
                   preferred_element_type=f32, precision=_HIGHEST)  # (bt, N, 1) f32

    # mean / population std (unbiased=False) of the N attention scores (tiny).
    m = jnp.mean(a, axis=1, keepdims=True)                       # (bt, 1, 1)
    var = jnp.mean(jnp.square(a - m), axis=1, keepdims=True)
    std = jnp.sqrt(var)

    alpha = alpha_ref[0]
    beta = beta_ref[0]
    inv = pl.reciprocal(std + 1e-05, approx=False)               # exact 1/(std+eps)
    scale = alpha * inv
    shift = beta - scale * m
    a_norm = scale * a + shift                                   # (bt, N, 1)

    # bmm(atten, g^T) is a rank-1 outer product; fuse it with the residual add.
    # Padded batch rows: a == 0, std == 0 -> a_norm == beta, out row == 0 (finite,
    # no NaN/Inf); those rows are sliced off by the wrapper.
    out_ref[...] = (feat.astype(f32) + a_norm * g[:, None, :]).astype(out_ref.dtype)


def _fused_call(feat, w_t, alpha, beta, budget, vmem_limit):
    B, N, D = feat.shape
    itemsize = jnp.dtype(feat.dtype).itemsize
    per_batch = _tile_working_set_bytes(N, D, itemsize)

    # Largest bt that fits the temp-inclusive budget, capped so the grid keeps
    # >= min(B, 4) steps (pipeline overlap + both v7x TensorCores busy).
    bt = max(1, min(B, budget // max(per_batch, 1)))
    bt = min(bt, max(1, pl.cdiv(B, min(B, 4))))
    steps = pl.cdiv(B, bt)
    bp = steps * bt
    pad = bp - B
    feat_p = jnp.pad(feat, ((0, pad), (0, 0), (0, 0))) if pad else feat

    out = pl.pallas_call(
        _fused_kernel,
        out_shape=jax.ShapeDtypeStruct((bp, N, D), feat.dtype),
        grid=(steps,),
        in_specs=[
            pl.BlockSpec(memory_space=pltpu.MemorySpace.SMEM),    # alpha
            pl.BlockSpec(memory_space=pltpu.MemorySpace.SMEM),    # beta
            pl.BlockSpec((bt, N, D), lambda b: (b, 0, 0)),        # feat tile
            # W^T: constant block index -> revisited block, stays VMEM-resident
            # across grid steps (no per-step 256 KiB re-DMA).
            pl.BlockSpec((D, D), lambda b: (0, 0)),
        ],
        out_specs=pl.BlockSpec((bt, N, D), lambda b: (b, 0, 0)),
        input_output_aliases={2: 0},                              # reuse feat's HBM buffer
        compiler_params=pltpu.CompilerParams(
            dimension_semantics=("parallel",),
            vmem_limit_bytes=vmem_limit),
    )(alpha, beta, feat_p, w_t)
    return out[:B] if pad else out


# ---------------------------------------------------------------------------
# Chunked path (arbitrary N): 3 passes over feat, each tiled over N-chunks
# ---------------------------------------------------------------------------
def _sum_n_kernel(feat_ref, sum_ref):
    # feat_ref: (1, tn, D); sum_ref: (1, 1, D) f32 accumulator over the N axis.
    @pl.when(pl.program_id(1) == 0)
    def _():
        sum_ref[...] = jnp.zeros_like(sum_ref)
    sum_ref[...] += jnp.sum(feat_ref[...], axis=1, keepdims=True, dtype=jnp.float32)


def _atten_kernel(feat_ref, g_ref, a_ref):
    # feat_ref: (1, tn, D); g_ref: (1, 1, D) f32; a_ref: (1, tn, 1) f32.
    feat = feat_ref[...]
    g = g_ref[...]
    if feat.dtype != g.dtype:
        g = g.astype(feat.dtype)
    a_ref[...] = jnp.einsum("bnd,bkd->bnk", feat, g,
                            preferred_element_type=jnp.float32,
                            precision=_HIGHEST)


def _apply_kernel(feat_ref, g_ref, an_ref, out_ref):
    # out = feat + a_norm (x) g   (rank-1 update fused with the residual add)
    f32 = jnp.float32
    delta = an_ref[...] * g_ref[...]                    # (1,tn,1)*(1,1,D) -> (1,tn,D)
    out_ref[...] = (feat_ref[...].astype(f32) + delta).astype(out_ref.dtype)


def _chunked_call(feat, w_t, alpha, beta, budget, vmem_limit):
    # TODO(synk): this 3-pass path reads `feat` three times from HBM; a manual
    # per-batch double-buffered pipeline could trim that, at the cost of much
    # more code, but it is only used when one (N, D) slab exceeds the budget.
    B, N, D = feat.shape
    itemsize = jnp.dtype(feat.dtype).itemsize
    f32 = jnp.float32

    per_row = _tile_working_set_bytes(1, D, itemsize)
    rows = max(8, budget // max(per_row, 1))
    nc = pl.cdiv(N, min(N, rows))                      # number of N-chunks
    tn = -(-pl.cdiv(N, nc) // 8) * 8                   # balanced chunk, sublane multiple
    np_ = nc * tn
    pad_n = np_ - N
    feat_p = jnp.pad(feat, ((0, 0), (0, pad_n), (0, 0))) if pad_n else feat

    # Pass 1: per-batch sum over N (accumulated across N-chunks; zero padding
    # does not bias the sum and we divide by the true N below).
    sum_f = pl.pallas_call(
        _sum_n_kernel,
        out_shape=jax.ShapeDtypeStruct((B, 1, D), f32),
        grid=(B, nc),
        in_specs=[pl.BlockSpec((1, tn, D), lambda b, n: (b, n, 0))],
        out_specs=pl.BlockSpec((1, 1, D), lambda b, n: (b, 0, 0)),
        compiler_params=pltpu.CompilerParams(
            dimension_semantics=("parallel", "arbitrary"),
            vmem_limit_bytes=vmem_limit),
    )(feat_p)
    mean_f = sum_f[:, 0, :] * (1.0 / N)                          # (B, D)
    g = jnp.dot(mean_f, w_t, precision=_HIGHEST)                 # (B, D), tiny
    g3 = g[:, None, :]                                           # (B, 1, D)

    # Pass 2: attention scores per N-chunk (MXU).
    a3 = pl.pallas_call(
        _atten_kernel,
        out_shape=jax.ShapeDtypeStruct((B, np_, 1), f32),
        grid=(B, nc),
        in_specs=[pl.BlockSpec((1, tn, D), lambda b, n: (b, n, 0)),
                  pl.BlockSpec((1, 1, D), lambda b, n: (b, 0, 0))],
        out_specs=pl.BlockSpec((1, tn, 1), lambda b, n: (b, n, 0)),
        compiler_params=pltpu.CompilerParams(
            dimension_semantics=("parallel", "parallel"),
            vmem_limit_bytes=vmem_limit),
    )(feat_p, g3)
    a = a3[:, :N, 0]                                             # drop padded rows before stats

    # Per-batch normalization statistics (tiny (B, N) work, done in plain JAX).
    m = jnp.mean(a, axis=-1, keepdims=True)
    std = jnp.sqrt(jnp.mean(jnp.square(a - m), axis=-1, keepdims=True))
    scale = alpha[0] / (std + 1e-05)
    shift = beta[0] - scale * m
    a_norm = scale * a + shift                                   # (B, N)
    if pad_n:
        a_norm = jnp.pad(a_norm, ((0, 0), (0, pad_n)))

    # Pass 3: out = feat + a_norm (x) g, fused with the residual add.
    out = pl.pallas_call(
        _apply_kernel,
        out_shape=jax.ShapeDtypeStruct((B, np_, D), feat.dtype),
        grid=(B, nc),
        in_specs=[pl.BlockSpec((1, tn, D), lambda b, n: (b, n, 0)),
                  pl.BlockSpec((1, 1, D), lambda b, n: (b, 0, 0)),
                  pl.BlockSpec((1, tn, 1), lambda b, n: (b, n, 0))],
        out_specs=pl.BlockSpec((1, tn, D), lambda b, n: (b, n, 0)),
        input_output_aliases={0: 0},                             # reuse feat's HBM buffer
        compiler_params=pltpu.CompilerParams(
            dimension_semantics=("parallel", "parallel"),
            vmem_limit_bytes=vmem_limit),
    )(feat_p, g3, a_norm[:, :, None])
    return out[:, :N, :] if pad_n else out


# ---------------------------------------------------------------------------
# Public entry point
# ---------------------------------------------------------------------------
@functools.partial(jax.jit, static_argnames=("force_chunked",))
def global_enhance_v2(feat, w, alpha, beta, *, force_chunked=False):
    """feat: (B, N, D); w: (D, D) Conv1d weight (out_ch, in_ch); alpha, beta: (1,)."""
    B, N, D = feat.shape
    budget, vmem_limit = _vmem_budget_bytes()

    # Pre-transpose (and keep in f32) the Conv1d weight once on the host side so
    # the kernel never re-materializes a (D, D) transpose / cast per grid step.
    w_t = jnp.transpose(w).astype(jnp.float32)                   # (in, out)
    alpha = alpha.astype(jnp.float32)
    beta = beta.astype(jnp.float32)

    itemsize = jnp.dtype(feat.dtype).itemsize
    slab_fits = _tile_working_set_bytes(N, D, itemsize) <= budget
    if slab_fits and not force_chunked:
        return _fused_call(feat, w_t, alpha, beta, budget, vmem_limit)
    return _chunked_call(feat, w_t, alpha, beta, budget, vmem_limit)


def global_enhance_v2_ref(feat, w, alpha, beta):
    """Plain-JAX reference mirroring the PyTorch forward."""
    hp = lax.Precision.HIGHEST
    mean_f = jnp.mean(feat, axis=1)                              # (B, D)
    g = jnp.einsum("bi,oi->bo", mean_f, w, precision=hp)         # (B, D)
    a = jnp.einsum("bnd,bd->bn", feat, g, precision=hp)          # (B, N)
    m = jnp.mean(a, axis=-1, keepdims=True)                      # (B, 1)
    std = jnp.sqrt(jnp.mean((a - m) ** 2, axis=-1, keepdims=True))
    a_norm = alpha[0] * (a - m) / (std + 1e-05) + beta[0]        # (B, N)
    return feat + a_norm[..., None] * g[:, None, :]              # (B, N, D)


if __name__ == "__main__":
    # Module default input_dim=256; small token count / batch for the smoke test.
    B, N, D = 2, 8, 256
    key = jax.random.PRNGKey(0)
    k_feat, k_w = jax.random.split(key)
    feat = jax.random.normal(k_feat, (B, N, D), dtype=jnp.float32)
    # Conv1d(D, D, 1, bias=False) weight with the kernel dim squeezed -> (out, in)
    w = jax.random.normal(k_w, (D, D), dtype=jnp.float32) * 0.05
    alpha = jnp.array([1.0], dtype=jnp.float32)   # as in __init__
    beta = jnp.array([0.0], dtype=jnp.float32)    # as in __init__

    ref = global_enhance_v2_ref(feat, w, alpha, beta)

    # Fused (VMEM-resident slab) path.
    out = jax.block_until_ready(global_enhance_v2(feat, w, alpha, beta))
    assert out.shape == ref.shape, f"shape mismatch {out.shape} vs {ref.shape}"
    assert jnp.allclose(out, ref, atol=1e-3, rtol=1e-3), "fused path mismatch vs reference"

    # Also exercise the N-chunked fallback (used when a (N, D) slab exceeds the
    # VMEM budget) on the same small problem to keep it correctness-tested.
    out_chunked = jax.block_until_ready(
        global_enhance_v2(feat, w, alpha, beta, force_chunked=True))
    assert jnp.allclose(out_chunked, ref, atol=1e-3, rtol=1e-3), "chunked path mismatch"

    print("KERNEL_OK")
</pallas_src>

<mosaic_0001>
module attributes {stable_mosaic.version = 11 : i64} {
  func.func @_fused_kernel(%arg0: i32, %arg1: memref<1xf32, #tpu.memory_space<smem>>, %arg2: memref<1xf32, #tpu.memory_space<smem>>, %arg3: memref<1x8x256xf32, #tpu.memory_space<vmem>>, %arg4: memref<256x256xf32, #tpu.memory_space<vmem>>, %arg5: memref<1x8x256xf32, #tpu.memory_space<vmem>>) attributes {dimension_semantics = [#tpu.dimension_semantics<parallel>], iteration_bounds = array<i64: 2>, scalar_prefetch = 0 : i64, scratch_operands = 0 : i64, tpu.core_type = #tpu.core_type<tc>, window_params = [{transform_indices = @transform_0, window_bounds = array<i64: 1>}, {transform_indices = @transform_1, window_bounds = array<i64: 1>}, {transform_indices = @transform_2, window_bounds = array<i64: 1, 8, 256>}, {pipeline_mode = #tpu.pipeline_mode<synchronous>, transform_indices = @transform_3, window_bounds = array<i64: 256, 256>}, {transform_indices = @transform_4, window_bounds = array<i64: 1, 8, 256>}]} {
    %c0 = arith.constant 0 : index
    %c0_0 = arith.constant 0 : index
    %c0_1 = arith.constant 0 : index
    %0 = vector.load %arg3[%c0, %c0_0, %c0_1] : memref<1x8x256xf32, #tpu.memory_space<vmem>>, vector<1x8x256xf32>
    %cst = arith.constant dense<0.000000e+00> : vector<1x256xf32>
    %1 = vector.multi_reduction <add>, %0, %cst [1] : vector<1x8x256xf32> to vector<1x256xf32>
    %cst_2 = arith.constant 1.250000e-01 : f32
    %2 = vector.broadcast %cst_2 : f32 to vector<1x256xf32>
    %3 = arith.mulf %1, %2 : vector<1x256xf32>
    %c0_3 = arith.constant 0 : index
    %c0_4 = arith.constant 0 : index
    %4 = vector.load %arg4[%c0_3, %c0_4] : memref<256x256xf32, #tpu.memory_space<vmem>>, vector<256x256xf32>
    %cst_5 = arith.constant dense<0.000000e+00> : vector<1x256xf32>
    %5 = tpu.matmul %3, %4, %cst_5 {dimension_numbers = #tpu.dot_dimension_numbers<[1], [0], [0], [1], [0, 0, 1, 1], [], []>, precision = #tpu.contract_precision<fp32>} : vector<1x256xf32>, vector<256x256xf32>, vector<1x256xf32> -> vector<1x256xf32>
    %6 = vector.shape_cast %5 : vector<1x256xf32> to vector<1x1x256xf32>
    "tpu.trace_start"() <{level = 10 : i32, message = "bnd,bkd->bnk"}> : () -> ()
    %cst_6 = arith.constant dense<0.000000e+00> : vector<1x8x1xf32>
    %7 = tpu.matmul %0, %6, %cst_6 {dimension_numbers = #tpu.dot_dimension_numbers<[2], [2], [1], [1], [0, 0, 0, 1, 1, 1], [0], [0]>, precision = #tpu.contract_precision<fp32>} : vector<1x8x256xf32>, vector<1x1x256xf32>, vector<1x8x1xf32> -> vector<1x8x1xf32>
    "tpu.trace_stop"() : () -> ()
    %cst_7 = arith.constant dense<0.000000e+00> : vector<1x1xf32>
    %8 = vector.multi_reduction <add>, %7, %cst_7 [1] : vector<1x8x1xf32> to vector<1x1xf32>
    %9 = vector.shape_cast %8 : vector<1x1xf32> to vector<1x1x1xf32>
    %cst_8 = arith.constant 8.000000e+00 : f32
    %10 = vector.broadcast %cst_8 : f32 to vector<1x1x1xf32>
    %11 = arith.divf %9, %10 : vector<1x1x1xf32>
    %12 = vector.broadcast %11 : vector<1x1x1xf32> to vector<1x8x1xf32>
    %13 = arith.subf %7, %12 : vector<1x8x1xf32>
    %14 = arith.mulf %13, %13 : vector<1x8x1xf32>
    %cst_9 = arith.constant dense<0.000000e+00> : vector<1x1xf32>
    %15 = vector.multi_reduction <add>, %14, %cst_9 [1] : vector<1x8x1xf32> to vector<1x1xf32>
    %16 = vector.shape_cast %15 : vector<1x1xf32> to vector<1x1x1xf32>
    %cst_10 = arith.constant 8.000000e+00 : f32
    %17 = vector.broadcast %cst_10 : f32 to vector<1x1x1xf32>
    %18 = arith.divf %16, %17 : vector<1x1x1xf32>
    %19 = math.sqrt %18 : vector<1x1x1xf32>
    %c0_11 = arith.constant 0 : index
    %20 = memref.load %arg1[%c0_11] : memref<1xf32, #tpu.memory_space<smem>>
    %c0_12 = arith.constant 0 : index
    %21 = memref.load %arg2[%c0_12] : memref<1xf32, #tpu.memory_space<smem>>
    %cst_13 = arith.constant 9.99999974E-6 : f32
    %22 = vector.broadcast %cst_13 : f32 to vector<1x1x1xf32>
    %23 = arith.addf %19, %22 : vector<1x1x1xf32>
    %24 = tpu.reciprocal %23 : vector<1x1x1xf32> -> vector<1x1x1xf32>
    %25 = vector.broadcast %20 : f32 to vector<1x1x1xf32>
    %26 = arith.mulf %25, %24 : vector<1x1x1xf32>
    %27 = arith.mulf %26, %11 : vector<1x1x1xf32>
    %28 = vector.broadcast %21 : f32 to vector<1x1x1xf32>
    %29 = arith.subf %28, %27 : vector<1x1x1xf32>
    %30 = vector.broadcast %26 : vector<1x1x1xf32> to vector<1x8x1xf32>
    %31 = arith.mulf %30, %7 : vector<1x8x1xf32>
    %32 = vector.broadcast %29 : vector<1x1x1xf32> to vector<1x8x1xf32>
    %33 = arith.addf %31, %32 : vector<1x8x1xf32>
    %34 = vector.shape_cast %5 : vector<1x256xf32> to vector<1x1x256xf32>
    %35 = vector.broadcast %33 : vector<1x8x1xf32> to vector<1x8x256xf32>
    %36 = vector.broadcast %34 : vector<1x1x256xf32> to vector<1x8x256xf32>
    %37 = arith.mulf %35, %36 : vector<1x8x256xf32>
    %38 = arith.addf %0, %37 : vector<1x8x256xf32>
    %c0_14 = arith.constant 0 : index
    %c0_15 = arith.constant 0 : index
    %c0_16 = arith.constant 0 : index
    %39 = vector.load %arg5[%c0_14, %c0_15, %c0_16] : memref<1x8x256xf32, #tpu.memory_space<vmem>>, vector<1x8x256xf32>
    tpu.vector_store %arg5[%c0_14, %c0_15, %c0_16], %38 {strides = array<i32>} : memref<1x8x256xf32, #tpu.memory_space<vmem>>, vector<1x8x256xf32>,
    return
  }
  func.func @transform_0(%arg0: i32) -> i32 {
    %c0_i32 = arith.constant 0 : i32
    %c0_i32_0 = arith.constant 0 : i32
    return %c0_i32 : i32
  }
  func.func @transform_1(%arg0: i32) -> i32 {
    %c0_i32 = arith.constant 0 : i32
    %c0_i32_0 = arith.constant 0 : i32
    return %c0_i32 : i32
  }
  func.func @transform_2(%arg0: i32) -> (i32, i32, i32) {
    %c0_i32 = arith.constant 0 : i32
    %c0_i32_0 = arith.constant 0 : i32
    %c0_i32_1 = arith.constant 0 : i32
    return %arg0, %c0_i32, %c0_i32_0 : i32, i32, i32
  }
  func.func @transform_3(%arg0: i32) -> (i32, i32) {
    %c0_i32 = arith.constant 0 : i32
    %c0_i32_0 = arith.constant 0 : i32
    %c0_i32_1 = arith.constant 0 : i32
    return %c0_i32, %c0_i32_0 : i32, i32
  }
  func.func @transform_4(%arg0: i32) -> (i32, i32, i32) {
    %c0_i32 = arith.constant 0 : i32
    %c0_i32_0 = arith.constant 0 : i32
    %c0_i32_1 = arith.constant 0 : i32
    return %arg0, %c0_i32, %c0_i32_0 : i32, i32, i32
  }
}

</mosaic_0001>

<bundles_post_ra>
// kernel: global_enhance_v2.1
= control target key start
LH: loop header
LB: loop body
LE: loop exit
PB: predicated region body
PF: predicated region fallthrough
CT: control target
= control target key end

     0   :  { %s3345_s0 = inlined_call_operand.<no memory space> [shape: f32[1], index: 0, kind: input, shape index: {}]   ;;  %s3346_s1 = inlined_call_operand.<no memory space> [shape: f32[1], index: 1, kind: input, shape index: {}]   ;;  %s3347_s2 = inlined_call_operand.hbm [shape: f32[2,8,256], index: 2, kind: input, shape index: {}, may-alias: {2,4}]   ;;  %s3348_s3 = inlined_call_operand.vmem [shape: f32[256,256], index: 3, kind: input, shape index: {}]   ;;  %s3349_s4 = inlined_call_operand.hbm [shape: f32[2,8,256], index: 4, kind: output, shape index: {}, may-alias: {2,4}]  }
   0x1   :  { %9 = sst [smem:[#allocation2]] %s3345_s0 }
   0x2   :  { %10 = sst [smem:[#allocation3]] %s3346_s1 }
   0x3   :  { %11 = vsyncpa [#allocation5], 0 }
   0x4   :  { %13 = vsyncpa [#allocation5 + $0x1], 0 }
   0x5   :  { %14 = vsyncpa [#allocation6], 0 }
   0x6   :  { %16 = vsyncpa [#allocation6 + $0x1], 0  ;;  %s2312_s19 = smov 0   ;;  %s2314_s20 = smov 0  }
   0x7   :  { %s2316_s21 = smov 0   ;;  %s2318_s22 = smov 0  }
   0x8 LB: > { %s2333_s0 = sadd.s32 4294967295, %s2277_s22   ;;  %s1719_s1 = sadd.s32 4294967294, %s2277_s22   ;;  %s2277_s22 = sphi %s2318_s22, %s3738_s22   ;;  %s2273_s21 = sphi %s2316_s21, %s3737_s21   ;;  %s2269_s20 = sphi %s2314_s20, %s3736_s20   ;;  %s2265_s19 = sphi %s2312_s19, %s3735_s19  }
   0x9   : > { %s2337_s23 = sadd.s32 1, %s2277_s22   ;;  %s71_s24 = sadd.s32 1, %s2273_s21 }
   0xa   : > { %s68_s25 = ssub.s32 %s2277_s22, %s2337_s23  ;;  %p78_p0 = scmp.ne.s32.totalorder %s2273_s21, %s2269_s20 }
   0xb   : > { %p69_p1 = scmp.eq.s32.totalorder %s68_s25, 0  ;;  %p79_p2 = scmp.eq.s32.totalorder %s2277_s22, 0 }
   0xc   : > { %p84_p3 = scmp.ne.s32.totalorder %s2269_s20, %s2265_s19  ;;  %p85_p4 = scmp.eq.s32.totalorder %s2333_s0, 0 }
   0xd   : > { %s2349_s26 = scalar_select %p69_p1, %s2273_s21, %s71_s24  }
   0xe   : > { %p2351_p5 = por %p79_p2, %p78_p0  ;;  %p2355_p6 = por %p85_p4, %p84_p3 }
   0xf   : > { %p129_p7 = scmp.eq.s32.totalorder %s2333_s0, 1  ;;  %p135_p8 = scmp.eq.s32.totalorder %s1719_s1, 1 }
  0x10   : > { %p2141_p10 = scmp.lt.s32.totalorder %s2277_s22, 2  ;;  %s164_s5 = sand.u32 1, %s2273_s21  }
  0x11   : > { %p2362_p11 = por %p129_p7, %p78_p0  ;;  %p2366_p12 = por %p135_p8, %p84_p3 }
  0x12   : > { %s1733_s6 = sshll.u32 %s2277_s22, 8  ;;  %s1722_s7 = sshll.u32 %s164_s5, 4 }
  0x13   : > { %s3483_s29 = scalar_select %p2362_p11, 1, 0 }
  0x14   : > { %s3484_s30 = scalar_select %p2366_p12, 1, 0 }
  0x15   : > { %s2375_s10 = scalar_lea.hbm %s3347_s2, %s1733_s6  ;;  %s168_s11 = scalar_lea.vmem [#allocation4], %s1722_s7 }
  0x16   : > { %s176_s12 = sshll.u32 %s168_s11, 4  ;;  %p2379_p13 = pnand %p2141_p10, %p2351_p5  ;;  %s2383_s12 = int_to_ptr.vmem [resolvable:$true] %s176_s12 }
  0x17   : > { %s165_s14 = scalar_lea.sflag [#allocation5], %s164_s5  ;;  %s2181_s15 = scalar_lea.hbm %s2375_s10, 256 }
  0x18   : > { %p2182_p2 = scmp.ne.s32.totalorder %s2375_s10, %s2181_s15  ;;  %p2183_p3 = pneg %p2379_p13 }
  0x19   : > { %s2186_s18 = scalar_lea.hbm %s3347_s2, 512  ;;  %p2187_p5 = scmp.lt.u32.totalorder %s2375_s10, %s3347_s2 }
  0x1a   : > { %p2184_p4 = pnand %p2183_p3, %p2182_p2  ;;  %p2188_p8 = scmp.lt.u32.totalorder %s2186_s18, %s2181_s15 }
  0x1b   : > { %p2190_p9 = scmp.lt.u32.totalorder %s2181_s15, %s2375_s10 }
  0x1c   : > { %p2185_p7 = pneg %p2184_p4  ;;  %p2189_p10 = por %p2188_p8, %p2187_p5 }
  0x1e   : > { %p2191_p0 = por %p2190_p9, %p2189_p10 }
  0x20   : > { %p2192_p1 = pnand %p2191_p0, %p2185_p7 }
  0x22   : > { %2195 = shalt.err (!%p2192_p1)
}
  0x23   : > { %s2196_s25 = scalar_lea.vmem %s2383_s12, 256  ;;  %s2279_s27 = smov [#allocation4]  }
  0x24   : > { %p2197_p2 = scmp.ne.s32.totalorder %s2383_s12, %s2196_s25  ;;  %s2201_s5 = sshll.u32 %s2279_s27, 4  ;;  %s2202_s5 = int_to_ptr.vmem [resolvable:$false] %s2201_s5 }
  0x25   : > { %s2203_s6 = scalar_lea.vmem %s2202_s5, 512  ;;  %p2204_p11 = scmp.lt.s32.totalorder %s2383_s12, %s2202_s5 }
  0x26   : > { %p2199_p4 = pnand %p2197_p2, %p2183_p3  ;;  %p2205_p5 = scmp.lt.s32.totalorder %s2203_s6, %s2196_s25 }
  0x28   : > { %p2200_p12 = pneg %p2199_p4  ;;  %p2206_p8 = por %p2205_p5, %p2204_p11 }
  0x2a   : > { %p2207_p9 = pnand %p2206_p8, %p2200_p12 }
  0x2c   : > { %2210 = shalt.err (!%p2207_p9)
}
  0x2d   : > { %2136 = dma.hbm_to_vmem [thread:$0]  (!%p2379_p13), %s2375_s10, 256, %s2383_s12, %s165_s14  }
  0x2e   : > { %p3486_p0 = scmp.lt.s32.totalorder %s2277_s22, 3  ;;  %p3487_p1 = scmp.ge.s32.totalorder %s2277_s22, 1 }
  0x30   : > { %p182_p3 = pnand %p3487_p1, %p3486_p0 }
  0x32   : > { %185 = sbr.rel (%p182_p3) target bundleno = 708 (0x2c4), region = 36 }
  0x39   : > { %s2417_s7 = sand.u32 1, %s2269_s20  }
  0x3a   : > { %s1726_s8 = sshll.u32 %s2417_s7, 4  ;;  %s188_s9 = scalar_lea.sflag [#allocation5], %s2417_s7 }
  0x3b   : > { %s2423_s11 = scalar_lea.vmem [#allocation4], %s1726_s8 }
  0x3c   : > { %2256 = dma.done.wait (%p2355_p6), %s188_s9, 256  }
  0x3d   : > { %2258 = vsyncadd (%p2355_p6), %s188_s9, 4294967040  ;;  %v233_v0 = vld [vmem:[%s3348_s3 + $0x8] sm:$0xff]  ;;  %v235_v1 = vld [vmem:[%s3348_s3 + $0x18] sm:$0xff]  ;;  %s1618_s10 = sld [smem:[#allocation3]]  ;;  %s1734_s12 = sshll.u32 %s2333_s0, 8 }
  0x3e   : > { %v232_v2 = vld [vmem:[%s3348_s3] sm:$0xff]  ;;  %v296_v3 = vand.u32 4294901760, %v233_v0  ;;  %v300_v4 = vand.u32 4294901760, %v235_v1  ;;  %v234_v5 = vld [vmem:[%s3348_s3 + $0x10] sm:$0xff]  ;;  %v237_v7 = vld [vmem:[%s3348_s3 + $0x28] sm:$0xff]  ;;  %s215_s13 = scalar_lea.vmem [#allocation7], %s1726_s8  ;;  %s3301_s17 = scalar_lea.hbm %s3349_s4, %s1734_s12 }
  0x3f   : > { %v298_v6 = vand.u32 4294901760, %v232_v2  ;;  %v239_v8 = vld [vmem:[%s3348_s3 + $0x38] sm:$0xff]  ;;  %v302_v9 = vand.u32 4294901760, %v234_v5  ;;  %v304_v10 = vand.u32 4294901760, %v237_v7  ;;  %v236_v12 = vld [vmem:[%s3348_s3 + $0x20] sm:$0xff]  ;;  %v238_v13 = vld [vmem:[%s3348_s3 + $0x30] sm:$0xff] }
  0x40   : > { %v308_v11 = vand.u32 4294901760, %v239_v8  ;;  %v241_v14 = vld [vmem:[%s3348_s3 + $0x48] sm:$0xff]  ;;  %v2456_v15 = vpack.c.bf16 %v300_v4, %v296_v3  ;;  %v243_v16 = vld [vmem:[%s3348_s3 + $0x58] sm:$0xff]  ;;  %v240_v17 = vld [vmem:[%s3348_s3 + $0x40] sm:$0xff]  ;;  %v306_v23 = vand.u32 4294901760, %v236_v12  ;;  %v310_v24 = vand.u32 4294901760, %v238_v13 }
  0x41   : > { %v242_v18 = vld [vmem:[%s3348_s3 + $0x50] sm:$0xff]  ;;  %v2467_v19 = vpack.c.bf16 %v302_v9, %v298_v6  ;;  %v245_v21 = vld [vmem:[%s3348_s3 + $0x68] sm:$0xff]  ;;  %v247_v22 = vld [vmem:[%s3348_s3 + $0x78] sm:$0xff]  ;;  %v312_v25 = vand.u32 4294901760, %v241_v14  ;;  %v2479_v26 = vsub.f32 %v233_v0, %v296_v3  ;;  %v316_v27 = vand.u32 4294901760, %v243_v16  ;;  %s1649_s14 = sshll.u32 %s215_s13, 4  ;;  %s3303_s14 = int_to_ptr.vmem [resolvable:$true] %s1649_s14 }
  0x42   : > { %3488 = vst [vmem:[#allocation10_spill] sm:$0xff] %v2456_v15  ;;  %v2469_v20 = vpack.c.bf16 %v308_v11, %v304_v10  ;;  %1736 = vmatprep.subr.bf16.mxu1 %v2456_v15  ;;  %1928 = vmatprep.subr.bf16.mxu0 %v2456_v15  ;;  %v314_v28 = vand.u32 4294901760, %v240_v17  ;;  %v318_v29 = vand.u32 4294901760, %v242_v18  ;;  %v2483_v30 = vsub.f32 %v235_v1, %v300_v4  ;;  %v244_v34 = vld [vmem:[%s3348_s3 + $0x60] sm:$0xff]  ;;  %v246_v35 = vld [vmem:[%s3348_s3 + $0x70] sm:$0xff]  ;;  %v249_v40 = vld [vmem:[%s3348_s3 + $0x88] sm:$0xff] }
  0x43   : > { %3489 = vst [vmem:[#allocation11_spill] sm:$0xff] %v2467_v19  ;;  %3491 = vst [vmem:[#allocation13_spill] sm:$0xff] %v2479_v26  ;;  %1738 = vmatpush1.bf16.msra.mxu1 %v2467_v19  ;;  %1930 = vmatpush1.bf16.msra.mxu0 %v2467_v19  ;;  %v2487_v31 = vpack.c.bf16 %v310_v24, %v306_v23  ;;  %v320_v32 = vand.u32 4294901760, %v245_v21  ;;  %v324_v33 = vand.u32 4294901760, %v247_v22  ;;  %v251_v41 = vld [vmem:[%s3348_s3 + $0x98] sm:$0xff]  ;;  %v248_v46 = vld [vmem:[%s3348_s3 + $0x80] sm:$0xff] }
  0x44   : > { %3490 = vst [vmem:[#allocation12_spill] sm:$0xff] %v2469_v20  ;;  %3492 = vst [vmem:[#allocation14_spill] sm:$0xff] %v2483_v30  ;;  %1740 = vmatprep.subr.bf16.mxu1 %v2469_v20  ;;  %1932 = vmatprep.subr.bf16.mxu0 %v2469_v20  ;;  %v2495_v36 = vsub.f32 %v232_v2, %v298_v6  ;;  %v2497_v37 = vsub.f32 %v234_v5, %v302_v9  ;;  %v250_v47 = vld [vmem:[%s3348_s3 + $0x90] sm:$0xff]  ;;  %v322_v50 = vand.u32 4294901760, %v244_v34  ;;  %v253_v52 = vld [vmem:[%s3348_s3 + $0xa8] sm:$0xff]  ;;  %s1635_s0 = scalar_lea.sflag [#allocation6], %s2417_s7 }
  0x45   : > { %3493 = vst [vmem:[#allocation15_spill] sm:$0xff] %v2487_v31  ;;  %v2499_v38 = vsub.f32 %v237_v7, %v304_v10  ;;  %v2501_v39 = vpack.c.bf16 %v316_v27, %v312_v25  ;;  %v2509_v42 = vsub.f32 %v239_v8, %v308_v11  ;;  %v2511_v43 = vsub.f32 %v236_v12, %v306_v23  ;;  %v255_v57 = vld [vmem:[%s3348_s3 + $0xb8] sm:$0xff]  ;;  %v252_v58 = vld [vmem:[%s3348_s3 + $0xa0] sm:$0xff]  ;;  %v254_v63 = vld [vmem:[%s3348_s3 + $0xb0] sm:$0xff]  ;;  %s2211_s18 = scalar_lea.vmem %s3303_s14, 256  ;;  %p3732_p11 = scmp.ne.s32.totalorder %s3483_s29, 0 }
  0x46   : > { %3494 = vst [vmem:[#allocation16_spill] sm:$0xff] %v2495_v36  ;;  %3495 = vst [vmem:[#allocation17_spill] sm:$0xff] %v2497_v37  ;;  %v2513_v44 = vsub.f32 %v238_v13, %v310_v24  ;;  %v2515_v45 = vsub.f32 %v241_v14, %v312_v25  ;;  %v2525_v48 = vsub.f32 %v243_v16, %v316_v27  ;;  %v326_v51 = vand.u32 4294901760, %v246_v35  ;;  %v257_v0 = vld [vmem:[%s3348_s3 + $0xc8] sm:$0xff]  ;;  %v259_v1 = vld [vmem:[%s3348_s3 + $0xd8] sm:$0xff]  ;;  %p2212_p6 = scmp.ne.s32.totalorder %s3303_s14, %s2211_s18  ;;  %s2280_s8 = smov [#allocation7]  }
  0x47   : > { %3496 = vst [vmem:[#allocation18_spill] sm:$0xff] %v2499_v38  ;;  %3497 = vst [vmem:[#allocation19_spill] sm:$0xff] %v2501_v39  ;;  %1742 = vmatpush1.bf16.msra.mxu1 %v2487_v31  ;;  %1934 = vmatpush1.bf16.msra.mxu0 %v2487_v31  ;;  %v2527_v49 = vpack.c.bf16 %v318_v29, %v314_v28  ;;  %v2534_v53 = vsub.f32 %v240_v17, %v314_v28  ;;  %v328_v55 = vand.u32 4294901760, %v249_v40  ;;  %v256_v10 = vld [vmem:[%s3348_s3 + $0xc0] sm:$0xff]  ;;  %v258_v11 = vld [vmem:[%s3348_s3 + $0xd0] sm:$0xff]  ;;  %s2215_s28 = sshll.u32 %s2280_s8, 4  ;;  %s2216_s28 = int_to_ptr.vmem [resolvable:$false] %s2215_s28 }
  0x48   : > { %3498 = vst [vmem:[#allocation20_spill] sm:$0xff] %v2509_v42  ;;  %1744 = vmatprep.subr.bf16.mxu1 %v2501_v39  ;;  %1936 = vmatprep.subr.bf16.mxu0 %v2501_v39  ;;  %v2536_v54 = vpack.c.bf16 %v324_v33, %v320_v32  ;;  %v332_v56 = vand.u32 4294901760, %v251_v41  ;;  %v2544_v59 = vsub.f32 %v242_v18, %v318_v29  ;;  %v330_v61 = vand.u32 4294901760, %v248_v46  ;;  %v261_v23 = vld [vmem:[%s3348_s3 + $0xe8] sm:$0xff]  ;;  %v263_v24 = vld [vmem:[%s3348_s3 + $0xf8] sm:$0xff]  ;;  %p2213_p12 = pnand %p2212_p6, %p3732_p11  ;;  %s2217_s1 = scalar_lea.vmem %s2216_s28, 512 }
  0x49   : > { %3499 = vst [vmem:[#allocation21_spill] sm:$0xff] %v2527_v49  ;;  %v2546_v60 = vsub.f32 %v245_v21, %v320_v32  ;;  %v334_v62 = vand.u32 4294901760, %v250_v47  ;;  %v2557_v2 = vsub.f32 %v247_v22, %v324_v33  ;;  %v2559_v3 = vpack.c.bf16 %v326_v51, %v322_v50  ;;  %v260_v32 = vld [vmem:[%s3348_s3 + $0xe0] sm:$0xff]  ;;  %v262_v33 = vld [vmem:[%s3348_s3 + $0xf0] sm:$0xff]  ;;  %p2218_p7 = scmp.lt.s32.totalorder %s3303_s14, %s2216_s28  ;;  %p2219_p10 = scmp.lt.s32.totalorder %s2217_s1, %s2211_s18 }
  0x4a   : > { %3500 = vst [vmem:[#allocation22_spill] sm:$0xff] %v2536_v54  ;;  %v2561_v4 = vsub.f32 %v244_v34, %v322_v50  ;;  %v336_v5 = vand.u32 4294901760, %v253_v52  ;;  %v2565_v6 = vsub.f32 %v246_v35, %v326_v51  ;;  %v2567_v7 = vsub.f32 %v249_v40, %v328_v55  ;;  %p2214_p13 = pneg %p2213_p12 }
  0x4b   : > { %3501 = vst [vmem:[#allocation23_spill] sm:$0xff] %v2546_v60  ;;  %3502 = vst [vmem:[#allocation24_spill] sm:$0xff] %v2557_v2  ;;  %1746 = vmatpush1.bf16.msra.mxu1 %v2527_v49  ;;  %1938 = vmatpush1.bf16.msra.mxu0 %v2527_v49  ;;  %v340_v8 = vand.u32 4294901760, %v255_v57  ;;  %v338_v9 = vand.u32 4294901760, %v252_v58  ;;  %v2577_v12 = vpack.c.bf16 %v332_v56, %v328_v55  ;;  %v342_v13 = vand.u32 4294901760, %v254_v63  ;;  %v264_v55 = vld [vmem:[%s3348_s3 + $0x100] sm:$0xff]  ;;  %p2220_p2 = por %p2219_p10, %p2218_p7 }
  0x4c   : > { %3503 = vst [vmem:[#allocation25_spill] sm:$0xff] %v2559_v3  ;;  %3504 = vst [vmem:[#allocation26_spill] sm:$0xff] %v2561_v4  ;;  %1748 = vmatprep.subr.bf16.mxu1 %v2536_v54  ;;  %1940 = vmatprep.subr.bf16.mxu0 %v2536_v54  ;;  %v344_v14 = vand.u32 4294901760, %v257_v0  ;;  %v348_v16 = vand.u32 4294901760, %v259_v1  ;;  %v2579_v17 = vsub.f32 %v251_v41, %v332_v56  ;;  %v346_v28 = vand.u32 4294901760, %v256_v10  ;;  %v265_v41 = vld [vmem:[%s3348_s3 + $0x108] sm:$0xff] }
  0x4d   : > { %3505 = vst [vmem:[#allocation27_spill] sm:$0xff] %v2565_v6  ;;  %3506 = vst [vmem:[#allocation28_spill] sm:$0xff] %v2577_v12  ;;  %v2581_v18 = vpack.c.bf16 %v334_v62, %v330_v61  ;;  %v2583_v21 = vsub.f32 %v248_v46, %v330_v61  ;;  %v2585_v22 = vsub.f32 %v250_v47, %v334_v62  ;;  %v350_v29 = vand.u32 4294901760, %v258_v11  ;;  %v267_v46 = vld [vmem:[%s3348_s3 + $0x118] sm:$0xff]  ;;  %v266_v56 = vld [vmem:[%s3348_s3 + $0x110] sm:$0xff]  ;;  %p2221_p4 = pnand %p2220_p2, %p2214_p13 }
  0x4e   : > { %v2593_v25 = vpack.c.bf16 %v340_v8, %v336_v5  ;;  %v2595_v27 = vsub.f32 %v253_v52, %v336_v5  ;;  %v2605_v34 = vsub.f32 %v255_v57, %v340_v8  ;;  %v2607_v35 = vpack.c.bf16 %v342_v13, %v338_v9  ;;  %v271_v5 = vld [vmem:[%s3348_s3 + $0x138] sm:$0xff] }
  0x4f   : > { %3507 = vst [vmem:[#allocation29_spill] sm:$0xff] %v2581_v18  ;;  %1750 = vmatpush1.bf16.msra.mxu1 %v2559_v3  ;;  %1942 = vmatpush1.bf16.msra.mxu0 %v2559_v3  ;;  %v2609_v40 = vsub.f32 %v252_v58, %v338_v9  ;;  %v2619_v47 = vsub.f32 %v254_v63, %v342_v13  ;;  %v352_v51 = vand.u32 4294901760, %v261_v23  ;;  %v356_v52 = vand.u32 4294901760, %v263_v24  ;;  %v269_v63 = vld [vmem:[%s3348_s3 + $0x128] sm:$0xff] }
  0x50   : > { %3508 = vst [vmem:[#allocation30_spill] sm:$0xff] %v2593_v25  ;;  %3509 = vst [vmem:[#allocation31_spill] sm:$0xff] %v2605_v34  ;;  %1752 = vmatprep.subr.bf16.mxu1 %v2577_v12  ;;  %1944 = vmatprep.subr.bf16.mxu0 %v2577_v12  ;;  %v2621_v50 = vpack.c.bf16 %v348_v16, %v344_v14  ;;  %v2629_v57 = vsub.f32 %v257_v0, %v344_v14  ;;  %v354_v61 = vand.u32 4294901760, %v260_v32  ;;  %v268_v0 = vld [vmem:[%s3348_s3 + $0x120] sm:$0xff] }
  0x51   : > { %3510 = vst [vmem:[#allocation32_spill] sm:$0xff] %v2607_v35  ;;  %3511 = vst [vmem:[#allocation33_spill] sm:$0xff] %v2609_v40  ;;  %v2631_v58 = vsub.f32 %v259_v1, %v348_v16  ;;  %v358_v62 = vand.u32 4294901760, %v262_v33  ;;  %v2639_v8 = vpack.c.bf16 %v350_v29, %v346_v28  ;;  %v2641_v9 = vsub.f32 %v256_v10, %v346_v28  ;;  %v270_v1 = vld [vmem:[%s3348_s3 + $0x130] sm:$0xff] }
  0x52   : > { %3512 = vst [vmem:[#allocation34_spill] sm:$0xff] %v2619_v47  ;;  %3513 = vst [vmem:[#allocation35_spill] sm:$0xff] %v2621_v50  ;;  %v360_v13 = vand.u32 4294901760, %v265_v41  ;;  %v364_v12 = vand.u32 4294901760, %v267_v46  ;;  %v2651_v14 = vsub.f32 %v258_v11, %v350_v29  ;;  %v2653_v16 = vsub.f32 %v261_v23, %v352_v51  ;;  %v275_v11 = vld [vmem:[%s3348_s3 + $0x158] sm:$0xff] }
  0x53   : > { %3514 = vst [vmem:[#allocation36_spill] sm:$0xff] %v2629_v57  ;;  %3515 = vst [vmem:[#allocation37_spill] sm:$0xff] %v2631_v58  ;;  %1754 = vmatpush1.bf16.msra.mxu1 %v2581_v18  ;;  %1946 = vmatpush1.bf16.msra.mxu0 %v2581_v18  ;;  %v362_v10 = vand.u32 4294901760, %v264_v55  ;;  %v366_v28 = vand.u32 4294901760, %v266_v56  ;;  %v2657_v3 = vpack.c.bf16 %v356_v52, %v352_v51  ;;  %v368_v49 = vand.u32 4294901760, %v269_v63  ;;  %v273_v18 = vld [vmem:[%s3348_s3 + $0x148] sm:$0xff] }
  0x54   : > { %3516 = vst [vmem:[#allocation38_spill] sm:$0xff] %v2639_v8  ;;  %3517 = vst [vmem:[#allocation39_spill] sm:$0xff] %v2641_v9  ;;  %1756 = vmatprep.subr.bf16.mxu1 %v2593_v25  ;;  %1948 = vmatprep.subr.bf16.mxu0 %v2593_v25  ;;  %v2659_v54 = vsub.f32 %v263_v24, %v356_v52  ;;  %v372_v39 = vand.u32 4294901760, %v271_v5  ;;  %v2667_v23 = vpack.c.bf16 %v358_v62, %v354_v61  ;;  %v272_v24 = vld [vmem:[%s3348_s3 + $0x140] sm:$0xff]  ;;  %v274_v51 = vld [vmem:[%s3348_s3 + $0x150] sm:$0xff] }
  0x55   : > { %3518 = vst [vmem:[#allocation40_spill] sm:$0xff] %v2651_v14  ;;  %3519 = vst [vmem:[#allocation41_spill] sm:$0xff] %v2653_v16  ;;  %v2669_v29 = vsub.f32 %v260_v32, %v354_v61  ;;  %v370_v31 = vand.u32 4294901760, %v268_v0  ;;  %v374_v25 = vand.u32 4294901760, %v270_v1  ;;  %v2677_v52 = vsub.f32 %v262_v33, %v358_v62  ;;  %v277_v33 = vld [vmem:[%s3348_s3 + $0x168] sm:$0xff] }
  0x56   : > { %3520 = vst [vmem:[#allocation42_spill] sm:$0xff] %v2657_v3  ;;  %3521 = vst [vmem:[#allocation43_spill] sm:$0xff] %v2659_v54  ;;  %v2679_v20 = vpack.c.bf16 %v364_v12, %v360_v13  ;;  %v2681_v19 = vsub.f32 %v265_v41, %v360_v13  ;;  %v2683_v15 = vsub.f32 %v267_v46, %v364_v12  ;;  %v380_v54 = vand.u32 4294901760, %v275_v11  ;;  %v279_v41 = vld [vmem:[%s3348_s3 + $0x178] sm:$0xff]  ;;  %v276_v13 = vld [vmem:[%s3348_s3 + $0x160] sm:$0xff] }
  0x57   : > { %3522 = vst [vmem:[#allocation44_spill] sm:$0xff] %v2667_v23  ;;  %3523 = vst [vmem:[#allocation45_spill] sm:$0xff] %v2669_v29  ;;  %1758 = vmatpush1.bf16.msra.mxu1 %v2607_v35  ;;  %1950 = vmatpush1.bf16.msra.mxu0 %v2607_v35  ;;  %v2687_v32 = vpack.c.bf16 %v366_v28, %v362_v10  ;;  %v2689_v61 = vsub.f32 %v264_v55, %v362_v10  ;;  %v376_v29 = vand.u32 4294901760, %v273_v18  ;;  %v278_v10 = vld [vmem:[%s3348_s3 + $0x170] sm:$0xff]  ;;  %v217_v16 = vld [vmem:[%s2423_s11 + $0x8] sm:$0xff] }
  0x58   : > { %3524 = vst [vmem:[#allocation46_spill] sm:$0xff] %v2677_v52  ;;  %3525 = vst [vmem:[#allocation47_spill] sm:$0xff] %v2679_v20  ;;  %1760 = vmatprep.subr.bf16.mxu1 %v2621_v50  ;;  %1952 = vmatprep.subr.bf16.mxu0 %v2621_v50  ;;  %v2699_v12 = vsub.f32 %v266_v56, %v366_v28  ;;  %v2701_v46 = vpack.c.bf16 %v372_v39, %v368_v49  ;;  %v378_v55 = vand.u32 4294901760, %v272_v24  ;;  %v281_v28 = vld [vmem:[%s3348_s3 + $0x188] sm:$0xff]  ;;  %v283_v50 = vld [vmem:[%s3348_s3 + $0x198] sm:$0xff] }
  0x59   : > { %3526 = vst [vmem:[#allocation48_spill] sm:$0xff] %v2681_v19  ;;  %3527 = vst [vmem:[#allocation49_spill] sm:$0xff] %v2683_v15  ;;  %v382_v62 = vand.u32 4294901760, %v274_v51  ;;  %v2709_v35 = vsub.f32 %v269_v63, %v368_v49  ;;  %v2713_v15 = vpack.c.bf16 %v374_v25, %v370_v31  ;;  %v2715_v56 = vsub.f32 %v268_v0, %v370_v31  ;;  %v282_v31 = vld [vmem:[%s3348_s3 + $0x190] sm:$0xff] }
  0x5a   : > { %3528 = vst [vmem:[#allocation50_spill] sm:$0xff] %v2687_v32  ;;  %3529 = vst [vmem:[#allocation51_spill] sm:$0xff] %v2689_v61  ;;  %v2711_v61 = vsub.f32 %v271_v5, %v372_v39  ;;  %v2725_v19 = vsub.f32 %v273_v18, %v376_v29  ;;  %v384_v49 = vand.u32 4294901760, %v277_v33  ;;  %v388_v63 = vand.u32 4294901760, %v279_v41  ;;  %v280_v39 = vld [vmem:[%s3348_s3 + $0x180] sm:$0xff] }
  0x5b   : > { %3530 = vst [vmem:[#allocation52_spill] sm:$0xff] %v2699_v12  ;;  %3531 = vst [vmem:[#allocation53_spill] sm:$0xff] %v2701_v46  ;;  %v2723_v12 = vsub.f32 %v270_v1, %v374_v25  ;;  %1762 = vmatpush1.bf16.msra.mxu1 %v2639_v8  ;;  %1954 = vmatpush1.bf16.msra.mxu0 %v2639_v8  ;;  %v2735_v5 = vpack.c.bf16 %v380_v54, %v376_v29  ;;  %v386_v18 = vand.u32 4294901760, %v276_v13  ;;  %v285_v1 = vld [vmem:[%s3348_s3 + $0x1a8] sm:$0xff] }
  0x5c   : > { %3532 = vst [vmem:[#allocation54_spill] sm:$0xff] %v2709_v35  ;;  %3533 = vst [vmem:[#allocation55_spill] sm:$0xff] %v2711_v61  ;;  %v2737_v25 = vsub.f32 %v275_v11, %v380_v54  ;;  %v390_v0 = vand.u32 4294901760, %v278_v10  ;;  %1764 = vmatprep.subr.bf16.mxu1 %v2657_v3  ;;  %1956 = vmatprep.subr.bf16.mxu0 %v2657_v3  ;;  %v2749_v29 = vsub.f32 %v272_v24, %v378_v55  ;;  %v284_v35 = vld [vmem:[%s3348_s3 + $0x1a0] sm:$0xff]  ;;  %v286_v3 = vld [vmem:[%s3348_s3 + $0x1b0] sm:$0xff] }
  0x5d   : > { %3534 = vst [vmem:[#allocation56_spill] sm:$0xff] %v2713_v15  ;;  %3535 = vst [vmem:[#allocation57_spill] sm:$0xff] %v2715_v56  ;;  %v392_v54 = vand.u32 4294901760, %v281_v28  ;;  %v396_v11 = vand.u32 4294901760, %v283_v50  ;;  %v2751_v8 = vsub.f32 %v274_v51, %v382_v62  ;;  %v394_v56 = vand.u32 4294901760, %v280_v39  ;;  %v289_v51 = vld [vmem:[%s3348_s3 + $0x1c8] sm:$0xff] }
  0x5e   : > { %3536 = vst [vmem:[#allocation58_spill] sm:$0xff] %v2723_v12  ;;  %3537 = vst [vmem:[#allocation59_spill] sm:$0xff] %v2725_v19  ;;  %v287_v19 = vld [vmem:[%s3348_s3 + $0x1b8] sm:$0xff]  ;;  %v2747_v12 = vpack.c.bf16 %v382_v62, %v378_v55  ;;  %v398_v61 = vand.u32 4294901760, %v282_v31  ;;  %v2761_v52 = vpack.c.bf16 %v388_v63, %v384_v49  ;;  %v2763_v24 = vsub.f32 %v279_v41, %v388_v63 }
  0x5f   : > { %3538 = vst [vmem:[#allocation60_spill] sm:$0xff] %v2735_v5  ;;  %3539 = vst [vmem:[#allocation61_spill] sm:$0xff] %v2737_v25  ;;  %v2753_v25 = vsub.f32 %v277_v33, %v384_v49  ;;  %v400_v55 = vand.u32 4294901760, %v285_v1  ;;  %v291_v33 = vld [vmem:[%s3348_s3 + $0x1d8] sm:$0xff]  ;;  %1766 = vmatpush1.bf16.msra.mxu1 %v2667_v23  ;;  %1958 = vmatpush1.bf16.msra.mxu0 %v2667_v23  ;;  %v2773_v62 = vpack.c.bf16 %v390_v0, %v386_v18  ;;  %v288_v23 = vld [vmem:[%s3348_s3 + $0x1c0] sm:$0xff] }
  0x60   : > { %3540 = vst [vmem:[#allocation62_spill] sm:$0xff] %v2747_v12  ;;  %3541 = vst [vmem:[#allocation63_spill] sm:$0xff] %v2749_v29  ;;  %v404_v29 = vand.u32 4294901760, %v287_v19  ;;  %v2775_v49 = vsub.f32 %v276_v13, %v386_v18  ;;  %v2777_v41 = vsub.f32 %v278_v10, %v390_v0  ;;  %1768 = vmatprep.subr.bf16.mxu1 %v2679_v20  ;;  %1960 = vmatprep.subr.bf16.mxu0 %v2679_v20  ;;  %v290_v13 = vld [vmem:[%s3348_s3 + $0x1d0] sm:$0xff] }
  0x61   : > { %3542 = vst [vmem:[#allocation64_spill] sm:$0xff] %v2751_v8  ;;  %3543 = vst [vmem:[#allocation65_spill] sm:$0xff] %v2753_v25  ;;  %v2781_v63 = vpack.c.bf16 %v396_v11, %v392_v54  ;;  %v402_v25 = vand.u32 4294901760, %v284_v35  ;;  %v406_v8 = vand.u32 4294901760, %v286_v3  ;;  %v2791_v10 = vsub.f32 %v283_v50, %v396_v11 }
  0x62   : > { %3544 = vst [vmem:[#allocation66_spill] sm:$0xff] %v2761_v52  ;;  %3545 = vst [vmem:[#allocation67_spill] sm:$0xff] %v2763_v24  ;;  %v2783_v24 = vsub.f32 %v281_v28, %v392_v54  ;;  %v2793_v18 = vpack.c.bf16 %v398_v61, %v394_v56  ;;  %v408_v0 = vand.u32 4294901760, %v289_v51  ;;  %v412_v20 = vand.u32 4294901760, %v291_v33 }
  0x63   : > { %3546 = vst [vmem:[#allocation68_spill] sm:$0xff] %v2773_v62  ;;  %3547 = vst [vmem:[#allocation69_spill] sm:$0xff] %v2775_v49  ;;  %v2797_v28 = vsub.f32 %v282_v31, %v398_v61  ;;  %v2799_v54 = vpack.c.bf16 %v404_v29, %v400_v55  ;;  %v293_v49 = vld [vmem:[%s3348_s3 + $0x1e8] sm:$0xff]  ;;  %1770 = vmatpush1.bf16.msra.mxu1 %v2687_v32  ;;  %1962 = vmatpush1.bf16.msra.mxu0 %v2687_v32  ;;  %v414_v61 = vand.u32 4294901760, %v290_v13  ;;  %v216_v31 = vld [vmem:[%s2423_s11] sm:$0xff] }
  0x64   : > { %3548 = vst [vmem:[#allocation70_spill] sm:$0xff] %v2777_v41  ;;  %3549 = vst [vmem:[#allocation71_spill] sm:$0xff] %v2781_v63  ;;  %v2795_v41 = vsub.f32 %v280_v39, %v394_v56  ;;  %v2809_v50 = vsub.f32 %v287_v19, %v404_v29  ;;  %v2811_v11 = vsub.f32 %v284_v35, %v402_v25  ;;  %v410_v56 = vand.u32 4294901760, %v288_v23  ;;  %v295_v39 = vld [vmem:[%s3348_s3 + $0x1f8] sm:$0xff] }
  0x65   : > { %3550 = vst [vmem:[#allocation72_spill] sm:$0xff] %v2783_v24  ;;  %3551 = vst [vmem:[#allocation73_spill] sm:$0xff] %v2791_v10  ;;  %v2801_v24 = vsub.f32 %v285_v1, %v400_v55  ;;  %1772 = vmatprep.subr.bf16.mxu1 %v2701_v46  ;;  %1964 = vmatprep.subr.bf16.mxu0 %v2701_v46  ;;  %v2819_v1 = vpack.c.bf16 %v406_v8, %v402_v25  ;;  %v416_v29 = vand.u32 4294901760, %v293_v49 }
  0x66   : > { %3552 = vst [vmem:[#allocation74_spill] sm:$0xff] %v2793_v18  ;;  %3553 = vst [vmem:[#allocation75_spill] sm:$0xff] %v2795_v41  ;;  %v2821_v55 = vsub.f32 %v286_v3, %v406_v8  ;;  %v2823_v32 = vsub.f32 %v289_v51, %v408_v0  ;;  %v2825_v19 = vpack.c.bf16 %v412_v20, %v408_v0  ;;  %v224_v46 = vrot.slane %v217_v16, 4 }
  0x67   : > { %3554 = vst [vmem:[#allocation76_spill] sm:$0xff] %v2797_v28  ;;  %3555 = vst [vmem:[#allocation77_spill] sm:$0xff] %v2799_v54  ;;  %v2827_v35 = vsub.f32 %v291_v33, %v412_v20  ;;  %v420_v25 = vand.u32 4294901760, %v295_v39  ;;  %v443_v3 = vand.u32 4294901760, %v2479_v26  ;;  %v455_v8 = vand.u32 4294901760, %v2483_v30  ;;  %1774 = vmatpush1.bf16.msra.mxu1 %v2713_v15  ;;  %1966 = vmatpush1.bf16.msra.mxu0 %v2713_v15 }
  0x68   : > { %3556 = vst [vmem:[#allocation78_spill] sm:$0xff] %v2801_v24  ;;  %3557 = vst [vmem:[#allocation79_spill] sm:$0xff] %v2809_v50  ;;  %v294_v50 = vld [vmem:[%s3348_s3 + $0x1f0] sm:$0xff]  ;;  %v218_v51 = vrot.slane %v216_v31, 4  ;;  %v2839_v20 = vpack.c.bf16 %v414_v61, %v410_v56  ;;  %v2841_v33 = vsub.f32 %v288_v23, %v410_v56  ;;  %v225_v0 = vadd.f32 %v224_v46, %v217_v16 }
  0x69   : > { %3558 = vst [vmem:[#allocation80_spill] sm:$0xff] %v2811_v11  ;;  %3559 = vst [vmem:[#allocation81_spill] sm:$0xff] %v2819_v1  ;;  %v292_v11 = vld [vmem:[%s3348_s3 + $0x1e0] sm:$0xff]  ;;  %1776 = vmatprep.subr.bf16.mxu1 %v2735_v5  ;;  %1968 = vmatprep.subr.bf16.mxu0 %v2735_v5  ;;  %v461_v24 = vand.u32 4294901760, %v2497_v37  ;;  %v2847_v28 = vsub.f32 %v290_v13, %v414_v61  ;;  %v444_v15 = vsub.f32 %v2479_v26, %v443_v3 }
  0x6a   : > { %3560 = vst [vmem:[#allocation82_spill] sm:$0xff] %v2821_v55  ;;  %3561 = vst [vmem:[#allocation83_spill] sm:$0xff] %v2823_v32  ;;  %v422_v32 = vand.u32 4294901760, %v294_v50  ;;  %v449_v55 = vand.u32 4294901760, %v2495_v36  ;;  %v226_v41 = vrot.slane %v225_v0, 2  ;;  %v219_v10 = vadd.f32 %v218_v51, %v216_v31 }
  0x6b   : > { %3562 = vst [vmem:[#allocation84_spill] sm:$0xff] %v2825_v19  ;;  %3563 = vst [vmem:[#allocation85_spill] sm:$0xff] %v2827_v35  ;;  %v418_v35 = vand.u32 4294901760, %v292_v11  ;;  %v2850_v14 = vpack.c.bf16 %v420_v25, %v416_v29  ;;  %v2852_v23 = vsub.f32 %v293_v49, %v416_v29  ;;  %v456_v16 = vsub.f32 %v2483_v30, %v455_v8 }
  0x6c   : > { %3564 = vst [vmem:[#allocation86_spill] sm:$0xff] %v2839_v20  ;;  %v467_v46 = vand.u32 4294901760, %v2499_v38  ;;  %1778 = vmatpush1.bf16.msra.mxu1 %v2747_v12  ;;  %1970 = vmatpush1.bf16.msra.mxu0 %v2747_v12  ;;  %v2858_v56 = vsub.f32 %v295_v39, %v420_v25  ;;  %v227_v61 = vadd.f32 %v226_v41, %v225_v0  ;;  %v220_v5 = vrot.slane %v219_v10, 2 }
  0x6d   : > { %3565 = vst [vmem:[#allocation87_spill] sm:$0xff] %v2850_v14  ;;  %v2860_v13 = vsub.f32 %v292_v11, %v418_v35  ;;  %1780 = vmatprep.subr.bf16.mxu1 %v2761_v52  ;;  %1972 = vmatprep.subr.bf16.mxu0 %v2761_v52  ;;  %v2864_v49 = vpack.c.bf16 %v422_v32, %v418_v35  ;;  %v445_v30 = vand.u32 4294901760, %v444_v15  ;;  %v479_v39 = vand.u32 4294901760, %v2509_v42 }
  0x6e   : > { %v450_v31 = vsub.f32 %v2495_v36, %v449_v55  ;;  %v462_v29 = vsub.f32 %v2497_v37, %v461_v24  ;;  %v228_v51 = vrot.slane %v227_v61, 1  ;;  %v221_v26 = vadd.f32 %v220_v5, %v219_v10 }
  0x6f   : > { %3566 = vst [vmem:[#allocation88_spill] sm:$0xff] %v2860_v13  ;;  %3567 = vst [vmem:[#allocation89_spill] sm:$0xff] %v2864_v49  ;;  %v457_v25 = vand.u32 4294901760, %v456_v16  ;;  %v468_v11 = vsub.f32 %v2499_v38, %v467_v46  ;;  %v473_v41 = vand.u32 4294901760, %v2511_v43  ;;  %v485_v0 = vand.u32 4294901760, %v2513_v44 }
  0x70   : > { %1782 = vmatpush1.bf16.msra.mxu1 %v2773_v62  ;;  %1974 = vmatpush1.bf16.msra.mxu0 %v2773_v62  ;;  %v2874_v35 = vsub.f32 %v294_v50, %v422_v32  ;;  %v229_v52 = vadd.f32 %v228_v51, %v227_v61  ;;  %v2876_v12 = vpack.c.bf16 %v455_v8, %v443_v3  ;;  %v222_v15 = vrot.slane %v221_v26, 1 }
  0x71   : > { %1784 = vmatprep.subr.bf16.mxu1 %v2781_v63  ;;  %1976 = vmatprep.subr.bf16.mxu0 %v2781_v63  ;;  %v451_v5 = vand.u32 4294901760, %v450_v31  ;;  %v463_v10 = vand.u32 4294901760, %v462_v29  ;;  %v491_v16 = vand.u32 4294901760, %v2515_v45  ;;  %v503_v38 = vand.u32 4294901760, %v2525_v48 }
  0x72   : > { %v231_v37 = vmul.f32 0.125, %v229_v52  ;;  %v223_v36 = vadd.f32 %v222_v15, %v221_v26  ;;  %v2882_v13 = vpack.c.bf16 %v461_v24, %v449_v55  ;;  %v480_v32 = vsub.f32 %v2509_v42, %v479_v39 }
  0x73   : > { %v2885_v50 = vpack.c.bf16 %v457_v25, %v445_v30  ;;  %v469_v3 = vand.u32 4294901760, %v468_v11  ;;  %v474_v8 = vsub.f32 %v2511_v43, %v473_v41  ;;  %v486_v61 = vsub.f32 %v2513_v44, %v485_v0 }
  0x74   : > { %1786 = vmatpush1.bf16.msra.mxu1 %v2793_v18  ;;  %1978 = vmatpush1.bf16.msra.mxu0 %v2793_v18  ;;  %v2891_v31 = vand.u32 4294901760, %v231_v37  ;;  %v230_v29 = vmul.f32 0.125, %v223_v36  ;;  %v492_v26 = vsub.f32 %v2515_v45, %v491_v16  ;;  %v497_v52 = vand.u32 4294901760, %v2534_v53 }
  0x75   : > { %1788 = vmatprep.subr.bf16.mxu1 %v2799_v54  ;;  %1980 = vmatprep.subr.bf16.mxu0 %v2799_v54  ;;  %v2897_v30 = vpack.c.bf16 %v463_v10, %v451_v5  ;;  %v2899_v24 = vpack.c.bf16 %v479_v39, %v467_v46  ;;  %v504_v55 = vsub.f32 %v2525_v48, %v503_v38  ;;  %v509_v51 = vand.u32 4294901760, %v2544_v59 }
  0x76   : > { %3568 = vst [vmem:[#allocation90_spill] sm:$0xff] %v2891_v31  ;;  %v2904_v25 = vsub.f32 %v231_v37, %v2891_v31  ;;  %v2906_v36 = vand.u32 4294901760, %v230_v29  ;;  %v481_v11 = vand.u32 4294901760, %v480_v32  ;;  %v2908_v15 = vpack.c.bf16 %v485_v0, %v473_v41 }
  0x77   : > { %v475_v18 = vand.u32 4294901760, %v474_v8  ;;  %v487_v63 = vand.u32 4294901760, %v486_v61  ;;  %v515_v54 = vand.u32 4294901760, %v2546_v60  ;;  %v527_v5 = vand.u32 4294901760, %v2557_v2 }
  0x78   : > { %3569 = vst [vmem:[#allocation91_spill] sm:$0xff] %v2904_v25  ;;  %3570 = vst [vmem:[#allocation92_spill] sm:$0xff] %v2906_v36  ;;  %1790 = vmatpush1.bf16.msra.mxu1 %v2819_v1  ;;  %1982 = vmatpush1.bf16.msra.mxu0 %v2819_v1  ;;  %v426_v46 = vand.u32 4294901760, %v2904_v25  ;;  %v2916_v37 = vsub.f32 %v230_v29, %v2906_v36  ;;  %v493_v39 = vand.u32 4294901760, %v492_v26  ;;  %v505_v41 = vand.u32 4294901760, %v504_v55 }
  0x79   : > { %v498_v10 = vsub.f32 %v2534_v53, %v497_v52  ;;  %1792 = vmatprep.subr.bf16.mxu1 %v2825_v19  ;;  %1984 = vmatprep.subr.bf16.mxu0 %v2825_v19  ;;  %v510_v0 = vsub.f32 %v2544_v59, %v509_v51  ;;  %v521_v32 = vand.u32 4294901760, %v2561_v4  ;;  %v533_v8 = vand.u32 4294901760, %v2565_v6 }
  0x7a   : > { %3571 = vst [vmem:[#allocation93_spill] sm:$0xff] %v2916_v37  ;;  %v427_v61 = vsub.f32 %v2904_v25, %v426_v46  ;;  %1168 = vmatprep.mubr.f32.mxu0 %v426_v46  ;;  %v432_v29 = vand.u32 4294901760, %v2916_v37  ;;  %v1803_v1 = vpack.c.bf16 %v481_v11, %v469_v3  ;;  %v2926_v26 = vpack.c.bf16 %v503_v38, %v491_v16 }
  0x7b   : > { %v2928_v62 = vpack.c.bf16 %v487_v63, %v475_v18  ;;  %v516_v36 = vsub.f32 %v2546_v60, %v515_v54  ;;  %v528_v55 = vsub.f32 %v2557_v2, %v527_v5  ;;  %v539_v19 = vand.u32 4294901760, %v2567_v7 }
  0x7c   : > { %1794 = vmatpush1.bf16.msra.mxu1 %v2839_v20  ;;  %1986 = vmatpush1.bf16.msra.mxu0 %v2839_v20  ;;  %v428_v42 = vand.u32 4294901760, %v427_v61  ;;  %v433_v46 = vsub.f32 %v2916_v37, %v432_v29  ;;  %v522_v25 = vsub.f32 %v2561_v4, %v521_v32  ;;  %v534_v38 = vsub.f32 %v2565_v6, %v533_v8 }
  0x7d   : > { %1796 = vmatprep.subr.bf16.mxu1 %v2850_v14  ;;  %1988 = vmatprep.subr.bf16.mxu0 %v2850_v14  ;;  %v1807_v63 = vpack.c.bf16 %v505_v41, %v493_v39  ;;  %v499_v18 = vand.u32 4294901760, %v498_v10  ;;  %v511_v16 = vand.u32 4294901760, %v510_v0  ;;  %v551_v3 = vand.u32 4294901760, %v2579_v17 }
  0x7e   : > { %429 = vmatprep.mubr.f32.mxu1 %v428_v42  ;;  %v2941_v11 = vpack.c.bf16 %v509_v51, %v497_v52  ;;  %v545_v61 = vand.u32 4294901760, %v2583_v21  ;;  %v557_v37 = vand.u32 4294901760, %v2585_v22  ;;  %v563_v20 = vand.u32 4294901760, %v2595_v27 }
  0x7f   : > { %v434_v4 = vand.u32 4294901760, %v433_v46  ;;  %v517_v6 = vand.u32 4294901760, %v516_v36  ;;  %v529_v2 = vand.u32 4294901760, %v528_v55  ;;  %v540_v60 = vsub.f32 %v2567_v7, %v539_v19 }
  0x80   : > { %1798 = vmatpush1.bf16.msra.mxu1 %v2864_v49  ;;  %1990 = vmatpush1.bf16.msra.mxu0 %v2864_v49  ;;  %v2949_v39 = vpack.c.bf16 %v527_v5, %v515_v54  ;;  %v523_v42 = vand.u32 4294901760, %v522_v25  ;;  %v535_v52 = vand.u32 4294901760, %v534_v38  ;;  %v575_v51 = vand.u32 4294901760, %v2605_v34 }
  0x81   : > { %1800 = vmatprep.subr.bf16.mxu1 %v2885_v50  ;;  %1992 = vmatprep.subr.bf16.mxu0 %v2876_v12  ;;  %v1809_v10 = vpack.c.bf16 %v511_v16, %v499_v18  ;;  %v552_v36 = vsub.f32 %v2579_v17, %v551_v3  ;;  %v569_v41 = vand.u32 4294901760, %v2609_v40  ;;  %v581_v0 = vand.u32 4294901760, %v2619_v47 }
  0x82   : > { %v2957_v55 = vpack.c.bf16 %v533_v8, %v521_v32  ;;  %v546_v54 = vsub.f32 %v2583_v21, %v545_v61  ;;  %v558_v25 = vsub.f32 %v2585_v22, %v557_v37  ;;  %v564_v5 = vsub.f32 %v2595_v27, %v563_v20 }
  0x83   : > { %435 = vmatmul.mubr.f32.vlgmr.msra.gmra.mrb[0].mxu1 %v434_v4  ;;  %1172 = vmatmul.mubr.f32.vlgmr.msra.gmra.mrb[0].mxu0 %v432_v29  ;;  %v1811_v50 = vpack.c.bf16 %v529_v2, %v517_v6  ;;  %v541_v46 = vand.u32 4294901760, %v540_v60  ;;  %v576_v12 = vsub.f32 %v2605_v34, %v575_v51  ;;  %v570_v38 = vsub.f32 %v2609_v40, %v569_v41  ;;  %v3578_v34 = vld [vmem:[#allocation49_spill] sm:$0xff] }
  0x84   : > { %1802 = vmatpush1.bf16.msra.mxu1 %v2897_v30  ;;  %1994 = vmatpush1.bf16.msra.mxu0 %v2882_v13  ;;  %v1813_v32 = vpack.c.bf16 %v535_v52, %v523_v42  ;;  %v582_v8 = vsub.f32 %v2619_v47, %v581_v0  ;;  %v587_v18 = vand.u32 4294901760, %v2629_v57  ;;  %v599_v16 = vand.u32 4294901760, %v2631_v58  ;;  %v3572_v13 = vld [vmem:[#allocation40_spill] sm:$0xff] }
  0x85   : > { %1804 = vmatprep.subr.bf16.mxu1 %v1803_v1  ;;  %1996 = vmatprep.subr.bf16.mxu0 %v2899_v24  ;;  %v553_v2 = vand.u32 4294901760, %v552_v36  ;;  %v2007_v60 = vpack.c.bf16 %v551_v3, %v539_v19  ;;  %v2970_v4 = vpack.c.bf16 %v557_v37, %v545_v61  ;;  %v593_v6 = vand.u32 4294901760, %v2641_v9  ;;  %v3573_v24 = vld [vmem:[#allocation41_spill] sm:$0xff]  ;;  %v3574_v61 = vld [vmem:[#allocation43_spill] sm:$0xff]  ;;  %v3577_v47 = vld [vmem:[#allocation48_spill] sm:$0xff] }
  0x86   : > { %v547_v29 = vand.u32 4294901760, %v546_v54  ;;  %v559_v30 = vand.u32 4294901760, %v558_v25  ;;  %v565_v49 = vand.u32 4294901760, %v564_v5  ;;  %v605_v42 = vand.u32 4294901760, %v3572_v13  ;;  %826 = vmatprep.mubr.f32.mxu1 %v2891_v31  ;;  %1435 = vmatprep.mubr.f32.mxu0 %v2891_v31  ;;  %v3575_v25 = vld [vmem:[#allocation45_spill] sm:$0xff] }
  0x87   : > { %v577_v52 = vand.u32 4294901760, %v576_v12  ;;  %v2976_v14 = vpack.c.bf16 %v575_v51, %v563_v20  ;;  %v571_v1 = vand.u32 4294901760, %v570_v38  ;;  %v611_v36 = vand.u32 4294901760, %v3573_v24  ;;  %v3576_v12 = vld [vmem:[#allocation46_spill] sm:$0xff] }
  0x88   : > { %1806 = vmatpush1.bf16.msra.mxu1 %v2928_v62  ;;  %1998 = vmatpush1.bf16.msra.mxu0 %v2908_v15  ;;  %v583_v19 = vand.u32 4294901760, %v582_v8  ;;  %v588_v37 = vsub.f32 %v2629_v57, %v587_v18  ;;  %v600_v3 = vsub.f32 %v2631_v58, %v599_v16  ;;  %v623_v54 = vand.u32 4294901760, %v3574_v61 }
  0x89   : > { %1808 = vmatprep.subr.bf16.mxu1 %v1807_v63  ;;  %2000 = vmatprep.subr.bf16.mxu0 %v2926_v26  ;;  %v594_v20 = vsub.f32 %v2641_v9, %v593_v6  ;;  %v606_v51 = vsub.f32 %v3572_v13, %v605_v42  ;;  %v617_v5 = vand.u32 4294901760, %v3575_v25  ;;  %v629_v62 = vand.u32 4294901760, %v3576_v12 }
  0x8a   : > { %v1815_v38 = vpack.c.bf16 %v553_v2, %v541_v46  ;;  %v1817_v15 = vpack.c.bf16 %v559_v30, %v547_v29  ;;  %v612_v8 = vsub.f32 %v3573_v24, %v611_v36  ;;  %v624_v31 = vsub.f32 %v3574_v61, %v623_v54 }
  0x8b   : > { %v1819_v58 = vpack.c.bf16 %v577_v52, %v565_v49  ;;  %v2013_v57 = vpack.c.bf16 %v581_v0, %v569_v41  ;;  %v618_v63 = vsub.f32 %v3575_v25, %v617_v5  ;;  %v630_v26 = vsub.f32 %v3576_v12, %v629_v62  ;;  %v3579_v52 = vld [vmem:[#allocation51_spill] sm:$0xff] }
  0x8c   : > { %1810 = vmatpush1.bf16.msra.mxu1 %v1809_v10  ;;  %2002 = vmatpush1.bf16.msra.mxu0 %v2941_v11  ;;  %v589_v13 = vand.u32 4294901760, %v588_v37  ;;  %v601_v9 = vand.u32 4294901760, %v600_v3  ;;  %v635_v40 = vand.u32 4294901760, %v3577_v47  ;;  %v647_v46 = vand.u32 4294901760, %v3578_v34  ;;  %v3580_v10 = vld [vmem:[#allocation52_spill] sm:$0xff] }
  0x8d   : > { %1812 = vmatprep.subr.bf16.mxu1 %v1811_v50  ;;  %2004 = vmatprep.subr.bf16.mxu0 %v2949_v39  ;;  %v1821_v2 = vpack.c.bf16 %v583_v19, %v571_v1  ;;  %v2015_v29 = vpack.c.bf16 %v599_v16, %v587_v18  ;;  %v595_v49 = vand.u32 4294901760, %v594_v20  ;;  %v607_v41 = vand.u32 4294901760, %v606_v51  ;;  %v3581_v18 = vld [vmem:[#allocation54_spill] sm:$0xff]  ;;  %v3582_v1 = vld [vmem:[#allocation55_spill] sm:$0xff]  ;;  %v3583_v51 = vld [vmem:[#allocation57_spill] sm:$0xff] }
  0x8e   : > { %v613_v0 = vand.u32 4294901760, %v612_v8  ;;  %v625_v30 = vand.u32 4294901760, %v624_v31  ;;  %v641_v12 = vand.u32 4294901760, %v3579_v52  ;;  %v653_v25 = vand.u32 4294901760, %v3580_v10 }
  0x8f   : > { %v619_v11 = vand.u32 4294901760, %v618_v63  ;;  %v631_v37 = vand.u32 4294901760, %v630_v26  ;;  %v636_v3 = vsub.f32 %v3577_v47, %v635_v40  ;;  %v648_v61 = vsub.f32 %v3578_v34, %v647_v46  ;;  %v3584_v63 = vld [vmem:[#allocation58_spill] sm:$0xff] }
  0x90   : > { %1814 = vmatpush1.bf16.msra.mxu1 %v1813_v32  ;;  %2006 = vmatpush1.bf16.msra.mxu0 %v2957_v55  ;;  %v1823_v39 = vpack.c.bf16 %v601_v9, %v589_v13  ;;  %v2017_v50 = vpack.c.bf16 %v605_v42, %v593_v6  ;;  %v659_v16 = vand.u32 4294901760, %v3581_v18  ;;  %v671_v19 = vand.u32 4294901760, %v3582_v1 }
  0x91   : > { %1816 = vmatprep.subr.bf16.mxu1 %v1815_v38  ;;  %2008 = vmatprep.subr.bf16.mxu0 %v2007_v60  ;;  %v2019_v31 = vpack.c.bf16 %v623_v54, %v611_v36  ;;  %v3004_v20 = vpack.c.bf16 %v629_v62, %v617_v5  ;;  %v665_v8 = vand.u32 4294901760, %v3583_v51  ;;  %v677_v26 = vand.u32 4294901760, %v3584_v63  ;;  %v3585_v54 = vld [vmem:[#allocation59_spill] sm:$0xff]  ;;  %v3586_v62 = vld [vmem:[#allocation61_spill] sm:$0xff] }
  0x92   : > { %v1825_v47 = vpack.c.bf16 %v607_v41, %v595_v49  ;;  %v1827_v34 = vpack.c.bf16 %v625_v30, %v613_v0  ;;  %v642_v32 = vsub.f32 %v3579_v52, %v641_v12  ;;  %v654_v9 = vsub.f32 %v3580_v10, %v653_v25  ;;  %v3588_v0 = vld [vmem:[#allocation64_spill] sm:$0xff] }
  0x93   : > { %v1829_v55 = vpack.c.bf16 %v631_v37, %v619_v11  ;;  %v637_v6 = vand.u32 4294901760, %v636_v3  ;;  %v649_v13 = vand.u32 4294901760, %v648_v61  ;;  %v3010_v42 = vpack.c.bf16 %v647_v46, %v635_v40  ;;  %v3633_v52 = vld [vmem:[#allocation72_spill] sm:$0xff] }
  0x94   : > { %1818 = vmatpush1.bf16.msra.mxu1 %v1817_v15  ;;  %2010 = vmatpush1.bf16.msra.mxu0 %v2970_v4  ;;  %v660_v60 = vsub.f32 %v3581_v18, %v659_v16  ;;  %v672_v36 = vsub.f32 %v3582_v1, %v671_v19  ;;  %v683_v5 = vand.u32 4294901760, %v3585_v54  ;;  %v695_v38 = vand.u32 4294901760, %v3586_v62  ;;  %v3587_v4 = vld [vmem:[#allocation63_spill] sm:$0xff]  ;;  %v3591_v18 = vld [vmem:[#allocation69_spill] sm:$0xff] }
  0x95   : > { %1820 = vmatprep.subr.bf16.mxu1 %v1819_v58  ;;  %2012 = vmatprep.subr.bf16.mxu0 %v2976_v14  ;;  %v3018_v49 = vpack.c.bf16 %v653_v25, %v641_v12  ;;  %v666_v61 = vsub.f32 %v3583_v51, %v665_v8  ;;  %v678_v40 = vsub.f32 %v3584_v63, %v677_v26  ;;  %v643_v15 = vand.u32 4294901760, %v642_v32  ;;  %v3589_v12 = vld [vmem:[#allocation65_spill] sm:$0xff]  ;;  %v3590_v63 = vld [vmem:[#allocation67_spill] sm:$0xff] }
  0x96   : > { %v655_v46 = vand.u32 4294901760, %v654_v9  ;;  %v689_v41 = vand.u32 4294901760, %v3587_v4  ;;  %v701_v30 = vand.u32 4294901760, %v3588_v0  ;;  %v1831_v11 = vpack.c.bf16 %v649_v13, %v637_v6 }
  0x97   : > { %v3024_v37 = vpack.c.bf16 %v671_v19, %v659_v16  ;;  %v684_v3 = vsub.f32 %v3585_v54, %v683_v5  ;;  %v696_v58 = vsub.f32 %v3586_v62, %v695_v38  ;;  %v661_v14 = vand.u32 4294901760, %v660_v60  ;;  %v3592_v16 = vld [vmem:[#allocation70_spill] sm:$0xff] }
  0x98   : > { %1822 = vmatpush1.bf16.msra.mxu1 %v1821_v2  ;;  %2014 = vmatpush1.bf16.msra.mxu0 %v2013_v57  ;;  %v673_v25 = vand.u32 4294901760, %v672_v36  ;;  %v707_v51 = vand.u32 4294901760, %v3589_v12  ;;  %v719_v32 = vand.u32 4294901760, %v3590_v63  ;;  %v667_v9 = vand.u32 4294901760, %v666_v61 }
  0x99   : > { %1824 = vmatprep.subr.bf16.mxu1 %v1823_v39  ;;  %2016 = vmatprep.subr.bf16.mxu0 %v2015_v29  ;;  %v679_v1 = vand.u32 4294901760, %v678_v40  ;;  %v713_v6 = vand.u32 4294901760, %v3591_v18  ;;  %v725_v19 = vand.u32 4294901760, %v3592_v16  ;;  %v1833_v13 = vpack.c.bf16 %v655_v46, %v643_v15  ;;  %v3593_v15 = vld [vmem:[#allocation72_spill] sm:$0xff] }
  0x9a   : > { %v3032_v54 = vpack.c.bf16 %v677_v26, %v665_v8  ;;  %v690_v2 = vsub.f32 %v3587_v4, %v689_v41  ;;  %v702_v57 = vsub.f32 %v3588_v0, %v701_v30  ;;  %v685_v60 = vand.u32 4294901760, %v684_v3  ;;  %v3594_v0 = vld [vmem:[#allocation73_spill] sm:$0xff] }
  0x9b   : > { %v697_v36 = vand.u32 4294901760, %v696_v58  ;;  %v708_v62 = vsub.f32 %v3589_v12, %v707_v51  ;;  %v720_v39 = vsub.f32 %v3590_v63, %v719_v32  ;;  %v1835_v29 = vpack.c.bf16 %v673_v25, %v661_v14  ;;  %v3595_v12 = vld [vmem:[#allocation75_spill] sm:$0xff]  ;;  %v3596_v63 = vld [vmem:[#allocation76_spill] sm:$0xff] }
  0x9c   : > { %1826 = vmatpush1.bf16.msra.mxu1 %v1825_v47  ;;  %2018 = vmatpush1.bf16.msra.mxu0 %v2017_v50  ;;  %v714_v61 = vsub.f32 %v3591_v18, %v713_v6  ;;  %v726_v40 = vsub.f32 %v3592_v16, %v725_v19  ;;  %v1837_v8 = vpack.c.bf16 %v679_v1, %v667_v9  ;;  %v731_v46 = vand.u32 4294901760, %v3593_v15  ;;  %v3601_v16 = vld [vmem:[#allocation83_spill] sm:$0xff] }
  0x9d   : > { %1828 = vmatprep.subr.bf16.mxu1 %v1827_v34  ;;  %2020 = vmatprep.subr.bf16.mxu0 %v2019_v31  ;;  %v2031_v26 = vpack.c.bf16 %v695_v38, %v683_v5  ;;  %v743_v3 = vand.u32 4294901760, %v3594_v0  ;;  %v691_v58 = vand.u32 4294901760, %v690_v2  ;;  %v703_v4 = vand.u32 4294901760, %v702_v57  ;;  %v3597_v31 = vld [vmem:[#allocation78_spill] sm:$0xff]  ;;  %v3598_v38 = vld [vmem:[#allocation79_spill] sm:$0xff] }
  0x9e   : > { %v737_v10 = vand.u32 4294901760, %v3595_v12  ;;  %v749_v47 = vand.u32 4294901760, %v3596_v63  ;;  %v1839_v50 = vpack.c.bf16 %v697_v36, %v685_v60  ;;  %v3044_v14 = vpack.c.bf16 %v701_v30, %v689_v41  ;;  %v3599_v41 = vld [vmem:[#allocation80_spill] sm:$0xff] }
  0x9f   : > { %v709_v25 = vand.u32 4294901760, %v708_v62  ;;  %v721_v18 = vand.u32 4294901760, %v720_v39  ;;  %v715_v34 = vand.u32 4294901760, %v714_v61  ;;  %v727_v1 = vand.u32 4294901760, %v726_v40  ;;  %v3600_v62 = vld [vmem:[#allocation82_spill] sm:$0xff] }
  0xa0   : > { %1830 = vmatpush1.bf16.msra.mxu1 %v1829_v55  ;;  %2022 = vmatpush1.bf16.msra.mxu0 %v3004_v20  ;;  %v755_v5 = vand.u32 4294901760, %v3597_v31  ;;  %v767_v9 = vand.u32 4294901760, %v3598_v38  ;;  %v732_v2 = vsub.f32 %v3593_v15, %v731_v46  ;;  %v744_v57 = vsub.f32 %v3594_v0, %v743_v3 }
  0xa1   : > { %1832 = vmatprep.subr.bf16.mxu1 %v1831_v11  ;;  %2024 = vmatprep.subr.bf16.mxu0 %v3010_v42  ;;  %v761_v30 = vand.u32 4294901760, %v3599_v41  ;;  %v773_v60 = vand.u32 4294901760, %v3600_v62  ;;  %v1841_v55 = vpack.c.bf16 %v703_v4, %v691_v58  ;;  %v2035_v36 = vpack.c.bf16 %v719_v32, %v707_v51  ;;  %v3602_v51 = vld [vmem:[#allocation85_spill] sm:$0xff] }
  0xa2   : > { %v738_v20 = vsub.f32 %v3595_v12, %v737_v10  ;;  %v750_v39 = vsub.f32 %v3596_v63, %v749_v47  ;;  %v756_v61 = vsub.f32 %v3597_v31, %v755_v5  ;;  %v768_v11 = vsub.f32 %v3598_v38, %v767_v9 }
  0xa3   : > { %v762_v42 = vsub.f32 %v3599_v41, %v761_v30  ;;  %v774_v40 = vsub.f32 %v3600_v62, %v773_v60  ;;  %v1843_v0 = vpack.c.bf16 %v721_v18, %v709_v25  ;;  %v2037_v15 = vpack.c.bf16 %v725_v19, %v713_v6 }
  0xa4   : > { %1834 = vmatpush1.bf16.msra.mxu1 %v1833_v13  ;;  %2026 = vmatpush1.bf16.msra.mxu0 %v3018_v49  ;;  %v779_v4 = vand.u32 4294901760, %v3601_v16  ;;  %v791_v32 = vand.u32 4294901760, %v3602_v51  ;;  %v1845_v58 = vpack.c.bf16 %v727_v1, %v715_v34  ;;  %v733_v31 = vand.u32 4294901760, %v732_v2 }
  0xa5   : > { %1836 = vmatprep.subr.bf16.mxu1 %v1835_v29  ;;  %2028 = vmatprep.subr.bf16.mxu0 %v3024_v37  ;;  %v745_v63 = vand.u32 4294901760, %v744_v57  ;;  %v2039_v38 = vpack.c.bf16 %v743_v3, %v731_v46  ;;  %v739_v12 = vand.u32 4294901760, %v738_v20  ;;  %v751_v41 = vand.u32 4294901760, %v750_v39 }
  0xa6   : > { %v780_v62 = vsub.f32 %v3601_v16, %v779_v4  ;;  %v792_v13 = vsub.f32 %v3602_v51, %v791_v32  ;;  %v757_v49 = vand.u32 4294901760, %v756_v61  ;;  %v769_v18 = vand.u32 4294901760, %v768_v11 }
  0xa7   : > { %v763_v6 = vand.u32 4294901760, %v762_v42  ;;  %v775_v19 = vand.u32 4294901760, %v774_v40  ;;  %v3478_v37 = vand.u32 4294901760, %v2841_v33  ;;  %v3477_v34 = vand.u32 4294901760, %v2847_v28  ;;  %v3639_v40 = vld [vmem:[#allocation80_spill] sm:$0xff] }
  0xa8   : > { %1838 = vmatpush1.bf16.msra.mxu1 %v1837_v8  ;;  %2030 = vmatpush1.bf16.msra.mxu0 %v3032_v54  ;;  %v781_v29 = vand.u32 4294901760, %v780_v62  ;;  %v793_v25 = vand.u32 4294901760, %v792_v13  ;;  %v1847_v46 = vpack.c.bf16 %v745_v63, %v733_v31  ;;  %v2041_v3 = vpack.c.bf16 %v749_v47, %v737_v10  ;;  %v3603_v8 = vld [vmem:[#allocation88_spill] sm:$0xff]  ;;  %v3608_v13 = vld [vmem:[#allocation31_spill] sm:$0xff]  ;;  %v3626_v31 = vld [vmem:[#allocation61_spill] sm:$0xff] }
  0xa9   : > { %1840 = vmatprep.subr.bf16.mxu1 %v1839_v50  ;;  %2032 = vmatprep.subr.bf16.mxu0 %v2031_v26  ;;  %v3476_v1 = vand.u32 4294901760, %v2852_v23  ;;  %v3475_v2 = vand.u32 4294901760, %v2858_v56  ;;  %v1849_v57 = vpack.c.bf16 %v751_v41, %v739_v12  ;;  %v2043_v20 = vpack.c.bf16 %v767_v9, %v755_v5  ;;  %v3604_v5 = vld [vmem:[#allocation23_spill] sm:$0xff]  ;;  %v3605_v9 = vld [vmem:[#allocation24_spill] sm:$0xff] }
  0xaa   : > { %v2045_v39 = vpack.c.bf16 %v773_v60, %v761_v30  ;;  %v3474_v61 = vand.u32 4294901760, %v3603_v8  ;;  %v1851_v54 = vpack.c.bf16 %v769_v18, %v757_v49  ;;  %v1853_v62 = vpack.c.bf16 %v775_v19, %v763_v6  ;;  %v3606_v60 = vld [vmem:[#allocation26_spill] sm:$0xff]  ;;  %v3609_v18 = vld [vmem:[#allocation33_spill] sm:$0xff]  ;;  %v3620_v19 = vld [vmem:[#allocation52_spill] sm:$0xff] }
  0xab   : > { %v2047_v11 = vpack.c.bf16 %v791_v32, %v779_v4  ;;  %v3473_v42 = vand.u32 4294901760, %v2874_v35  ;;  %v1855_v26 = vpack.c.bf16 %v793_v25, %v781_v29  ;;  %v786_v10 = vsub.f32 %v2841_v33, %v3478_v37  ;;  %v3610_v6 = vld [vmem:[#allocation34_spill] sm:$0xff]  ;;  %v3611_v29 = vld [vmem:[#allocation36_spill] sm:$0xff]  ;;  %v3612_v25 = vld [vmem:[#allocation37_spill] sm:$0xff] }
  0xac   : > { %1842 = vmatpush1.bf16.msra.mxu1 %v1841_v55  ;;  %2034 = vmatpush1.bf16.msra.mxu0 %v3044_v14  ;;  %v798_v63 = vsub.f32 %v2847_v28, %v3477_v34  ;;  %v804_v12 = vsub.f32 %v2852_v23, %v3476_v1  ;;  %v816_v47 = vsub.f32 %v2858_v56, %v3475_v2  ;;  %v3607_v55 = vld [vmem:[#allocation27_spill] sm:$0xff]  ;;  %v3619_v49 = vld [vmem:[#allocation49_spill] sm:$0xff]  ;;  %v3636_v34 = vld [vmem:[#allocation76_spill] sm:$0xff] }
  0xad   : > { %1844 = vmatprep.subr.bf16.mxu1 %v1843_v0  ;;  %2036 = vmatprep.subr.bf16.mxu0 %v2035_v36  ;;  %v810_v14 = vsub.f32 %v3603_v8, %v3474_v61  ;;  %v822_v30 = vsub.f32 %v2874_v35, %v3473_v42  ;;  %v787_v32 = vand.u32 4294901760, %v786_v10  ;;  %v3630_v50 = vld [vmem:[#allocation67_spill] sm:$0xff]  ;;  %v3631_v10 = vld [vmem:[#allocation69_spill] sm:$0xff]  ;;  %v3632_v61 = vld [vmem:[#allocation70_spill] sm:$0xff] }
  0xae   : > { %v799_v36 = vand.u32 4294901760, %v798_v63  ;;  %v805_v2 = vand.u32 4294901760, %v804_v12  ;;  %v3635_v41 = vld [vmem:[#allocation75_spill] sm:$0xff]  ;;  %v3637_v63 = vld [vmem:[#allocation78_spill] sm:$0xff]  ;;  %v817_v24 = vand.u32 4294901760, %v816_v47  ;;  %v3642_v47 = vand.u32 4294901760, %v2847_v28 }
  0xaf   : > { %v3638_v0 = vld [vmem:[#allocation79_spill] sm:$0xff]  ;;  %v811_v37 = vand.u32 4294901760, %v810_v14  ;;  %v823_v1 = vand.u32 4294901760, %v822_v30  ;;  %v3644_v12 = vand.u32 4294901760, %v2858_v56  ;;  %v3647_v14 = vld [vmem:[#allocation13_spill] sm:$0xff]  ;;  %v3648_v30 = vld [vmem:[#allocation14_spill] sm:$0xff] }
  0xb0   : > { %1846 = vmatpush1.bf16.msra.mxu1 %v1845_v58  ;;  %2038 = vmatpush1.bf16.msra.mxu0 %v2037_v15  ;;  %v3628_v58 = vld [vmem:[#allocation64_spill] sm:$0xff]  ;;  %v3640_v15 = vld [vmem:[#allocation82_spill] sm:$0xff] }
  0xb1   : > { %1848 = vmatprep.subr.bf16.mxu1 %v1847_v46  ;;  %2040 = vmatprep.subr.bf16.mxu0 %v2039_v38  ;;  %v3634_v46 = vld [vmem:[#allocation73_spill] sm:$0xff]  ;;  %v1925_v38 = vpack.c.bf16 %v2874_v35, %v3603_v8 }
  0xb4   : > { %1850 = vmatpush1.bf16.msra.mxu1 %v1849_v57  ;;  %2042 = vmatpush1.bf16.msra.mxu0 %v2041_v3  ;;  %v1859_v57 = vpack.c.bf16 %v817_v24, %v805_v2  ;;  %v3643_v3 = vand.u32 4294901760, %v2852_v23  ;;  %v3649_v24 = vld [vmem:[#allocation16_spill] sm:$0xff]  ;;  %v3650_v2 = vld [vmem:[#allocation17_spill] sm:$0xff] }
  0xb5   : > { %1852 = vmatprep.subr.bf16.mxu1 %v1851_v54  ;;  %2044 = vmatprep.subr.bf16.mxu0 %v2043_v20  ;;  %v1857_v54 = vpack.c.bf16 %v799_v36, %v787_v32  ;;  %v3641_v20 = vand.u32 4294901760, %v2841_v33  ;;  %v3646_v36 = vand.u32 4294901760, %v2874_v35 }
  0xb6   : > { %v2051_v42 = vpack.c.bf16 %v3644_v12, %v3643_v3  ;;  %v3651_v3 = vld [vmem:[#allocation10_spill] sm:$0xff]  ;;  %v3654_v12 = vld [vmem:[#allocation92_spill] sm:$0xff] }
  0xb7   : > { %v2049_v4 = vpack.c.bf16 %v3642_v47, %v3641_v20  ;;  %v3658_v20 = vld [vmem:[#allocation90_spill] sm:$0xff]  ;;  %v3659_v47 = vpack.c.bf16 %v2513_v44, %v2511_v43  ;;  %v3667_v44 = vpack.c.bf16 %v3607_v55, %v3606_v60  ;;  %v3675_v55 = vpack.c.bf16 %v3610_v6, %v3609_v18 }
  0xb8   : > { %1854 = vmatpush1.bf16.msra.mxu1 %v1853_v62  ;;  %2046 = vmatpush1.bf16.msra.mxu0 %v2045_v39  ;;  %v1861_v62 = vpack.c.bf16 %v823_v1, %v811_v37  ;;  %v3645_v39 = vand.u32 4294901760, %v3603_v8  ;;  %v3653_v37 = vld [vmem:[#allocation20_spill] sm:$0xff]  ;;  %v3666_v43 = vld [vmem:[#allocation22_spill] sm:$0xff] }
  0xb9   : > { %1856 = vmatprep.subr.bf16.mxu1 %v1855_v26  ;;  %2048 = vmatprep.subr.bf16.mxu0 %v2047_v11  ;;  %v1863_v26 = vpack.c.bf16 %v3648_v30, %v3647_v14  ;;  %v1865_v11 = vpack.c.bf16 %v3650_v2, %v3649_v24  ;;  %v3664_v14 = vld [vmem:[#allocation21_spill] sm:$0xff]  ;;  %v3665_v30 = vpack.c.bf16 %v3605_v9, %v3604_v5  ;;  %v3674_v60 = vld [vmem:[#allocation30_spill] sm:$0xff] }
  0xba   : > { %v2053_v32 = vpack.c.bf16 %v3646_v36, %v3645_v39  ;;  %v3661_v39 = vpack.c.bf16 %v2525_v48, %v2515_v45  ;;  %v3662_v36 = vld [vmem:[#allocation19_spill] sm:$0xff]  ;;  %v3668_v45 = vld [vmem:[#allocation25_spill] sm:$0xff]  ;;  %v3669_v48 = vpack.c.bf16 %v2579_v17, %v2567_v7  ;;  %v3673_v9 = vpack.c.bf16 %v3608_v13, %v2595_v27  ;;  %v3676_v7 = vld [vmem:[#allocation32_spill] sm:$0xff] }
  0xbb   : > { %v3672_v5 = vld [vmem:[#allocation29_spill] sm:$0xff]  ;;  %v3677_v17 = vpack.c.bf16 %v3612_v25, %v3611_v29  ;;  %v3682_v27 = vld [vmem:[#allocation38_spill] sm:$0xff]  ;;  %v3683_v13 = vld [vmem:[#allocation43_spill] sm:$0xff] }
  0xbc   : > { %1858 = vmatpush1.bf16.msra.mxu1 %v1857_v54  ;;  %2050 = vmatpush1.bf16.msra.mxu0 %v2049_v4  ;;  %v3652_v4 = vld [vmem:[#allocation18_spill] sm:$0xff]  ;;  %v3657_v54 = vld [vmem:[#allocation91_spill] sm:$0xff]  ;;  %v3684_v2 = vld [vmem:[#allocation41_spill] sm:$0xff] }
  0xbd   : > { %1860 = vmatprep.subr.bf16.mxu1 %v1859_v57  ;;  %2052 = vmatprep.subr.bf16.mxu0 %v2051_v42  ;;  %v1867_v1 = vpack.c.bf16 %v3653_v37, %v3652_v4  ;;  %v3655_v42 = vld [vmem:[#allocation11_spill] sm:$0xff]  ;;  %v3656_v57 = vld [vmem:[#allocation12_spill] sm:$0xff]  ;;  %v3686_v18 = vld [vmem:[#allocation42_spill] sm:$0xff] }
  0xbe   : > { %v3687_v6 = vld [vmem:[#allocation46_spill] sm:$0xff]  ;;  %v3690_v29 = vld [vmem:[#allocation44_spill] sm:$0xff] }
  0xbf   : > { %v3691_v25 = vld [vmem:[#allocation48_spill] sm:$0xff] }
  0xc0   : > { %1862 = vmatpush1.bf16.msra.mxu1 %v1861_v62  ;;  %2054 = vmatpush1.bf16.msra.mxu0 %v2053_v32  ;;  %v3660_v62 = vld [vmem:[#allocation15_spill] sm:$0xff]  ;;  %v3663_v32 = vpack.c.bf16 %v2544_v59, %v2534_v53  ;;  %v3670_v53 = vld [vmem:[#allocation28_spill] sm:$0xff]  ;;  %v3671_v59 = vpack.c.bf16 %v2585_v22, %v2583_v21  ;;  %v3692_v37 = vpack.c.bf16 %v3619_v49, %v3691_v25 }
  0xc1   : > { %1864 = vmatprep.subr.bf16.mxu1 %v1863_v26  ;;  %2056 = vmatprep.subr.bf16.mxu0 %v3651_v3  ;;  %v3678_v21 = vld [vmem:[#allocation35_spill] sm:$0xff]  ;;  %v3679_v22 = vld [vmem:[#allocation40_spill] sm:$0xff]  ;;  %v3688_v3 = vld [vmem:[#allocation45_spill] sm:$0xff] }
  0xc2   : > { %v3680_v26 = vld [vmem:[#allocation39_spill] sm:$0xff]  ;;  %v3689_v4 = vpack.c.bf16 %v3687_v6, %v3688_v3  ;;  %v3704_v49 = vld [vmem:[#allocation56_spill] sm:$0xff] }
  0xc3   : > { %828 = vmatmul.mubr.f32.vlgmr.msra.gmra.mrb[0].mxu1 %v3654_v12  ;;  %1437 = vmatmul.mubr.f32.vlgmr.msra.gmra.mrb[0].mxu0 %v3654_v12  ;;  %v3681_v24 = vpack.c.bf16 %v3679_v22, %v3680_v26  ;;  %v2179_v8 = vld [vmem:[%s2423_s11] sm:$0xff] }
  0xc4   : > { %1866 = vmatpush1.bf16.msra.mxu1 %v1865_v11  ;;  %2058 = vmatpush1.bf16.msra.mxu0 %v3655_v42  ;;  %v3685_v11 = vpack.c.bf16 %v3683_v13, %v3684_v2  ;;  %v3694_v42 = vld [vmem:[#allocation51_spill] sm:$0xff] }
  0xc5   : > { %1868 = vmatprep.subr.bf16.mxu1 %v1867_v1  ;;  %2060 = vmatprep.subr.bf16.mxu0 %v3656_v57  ;;  %v3693_v1 = vld [vmem:[#allocation47_spill] sm:$0xff]  ;;  %v3695_v57 = vpack.c.bf16 %v3620_v19, %v3694_v42  ;;  %v3707_v19 = vld [vmem:[#allocation60_spill] sm:$0xff] }
  0xc6   : > { %1028 = vmatprep.mubr.f32.mxu1 %v3657_v54  ;;  %1572 = vmatprep.mubr.f32.mxu0 %v3658_v20  ;;  %v3696_v54 = vld [vmem:[#allocation50_spill] sm:$0xff]  ;;  %v3697_v20 = vld [vmem:[#allocation55_spill] sm:$0xff] }
  0xc8   : > { %1870 = vmatpush1.bf16.msra.mxu1 %v3659_v47  ;;  %2062 = vmatpush1.bf16.msra.mxu0 %v3660_v62  ;;  %v3698_v47 = vld [vmem:[#allocation54_spill] sm:$0xff] }
  0xc9   : > { %1872 = vmatprep.subr.bf16.mxu1 %v3661_v39  ;;  %2064 = vmatprep.subr.bf16.mxu0 %v3662_v36  ;;  %v3699_v62 = vpack.c.bf16 %v3697_v20, %v3698_v47  ;;  %v3700_v39 = vld [vmem:[#allocation53_spill] sm:$0xff]  ;;  %v3701_v36 = vld [vmem:[#allocation58_spill] sm:$0xff] }
  0xcc   : > { %1874 = vmatpush1.bf16.msra.mxu1 %v3663_v32  ;;  %2066 = vmatpush1.bf16.msra.mxu0 %v3664_v14  ;;  %v3702_v32 = vld [vmem:[#allocation57_spill] sm:$0xff] }
  0xcd   : > { %1876 = vmatprep.subr.bf16.mxu1 %v3665_v30  ;;  %2068 = vmatprep.subr.bf16.mxu0 %v3666_v43  ;;  %v3703_v14 = vpack.c.bf16 %v3701_v36, %v3702_v32  ;;  %v3705_v30 = vld [vmem:[#allocation59_spill] sm:$0xff] }
  0xce   : > { %v3706_v43 = vpack.c.bf16 %v3626_v31, %v3705_v30  ;;  %v3715_v31 = vld [vmem:[#allocation68_spill] sm:$0xff] }
  0xd0   : > { %1878 = vmatpush1.bf16.msra.mxu1 %v3667_v44  ;;  %2070 = vmatpush1.bf16.msra.mxu0 %v3668_v45  ;;  %v3708_v44 = vld [vmem:[#allocation63_spill] sm:$0xff] }
  0xd1   : > { %1880 = vmatprep.subr.bf16.mxu1 %v3669_v48  ;;  %2072 = vmatprep.subr.bf16.mxu0 %v3670_v53  ;;  %v3709_v45 = vpack.c.bf16 %v3628_v58, %v3708_v44  ;;  %v3710_v48 = vld [vmem:[#allocation62_spill] sm:$0xff]  ;;  %v3711_v53 = vld [vmem:[#allocation65_spill] sm:$0xff]  ;;  %v3717_v58 = vld [vmem:[#allocation71_spill] sm:$0xff] }
  0xd4   : > { %1882 = vmatpush1.bf16.msra.mxu1 %v3671_v59  ;;  %2074 = vmatpush1.bf16.msra.mxu0 %v3672_v5  ;;  %v3712_v59 = vpack.c.bf16 %v3630_v50, %v3711_v53  ;;  %v3713_v5 = vld [vmem:[#allocation66_spill] sm:$0xff] }
  0xd5   : > { %1884 = vmatprep.subr.bf16.mxu1 %v3673_v9  ;;  %2076 = vmatprep.subr.bf16.mxu0 %v3674_v60  ;;  %v3714_v9 = vpack.c.bf16 %v3632_v61, %v3631_v10  ;;  %v3716_v60 = vpack.c.bf16 %v3634_v46, %v3633_v52  ;;  %v3719_v50 = vld [vmem:[#allocation74_spill] sm:$0xff]  ;;  %v3721_v61 = vld [vmem:[#allocation77_spill] sm:$0xff]  ;;  %v3722_v10 = vpack.c.bf16 %v3640_v15, %v3639_v40  ;;  %v3729_v40 = vld [vmem:[#allocation87_spill] sm:$0xff] }
  0xd6   : > { %v3723_v52 = vld [vmem:[#allocation81_spill] sm:$0xff]  ;;  %v3724_v46 = vpack.c.bf16 %v3602_v51, %v3601_v16 }
  0xd7   : > { %v3730_v16 = vld [vmem:[#allocation89_spill] sm:$0xff] }
  0xd8   : > { %1886 = vmatpush1.bf16.msra.mxu1 %v3675_v55  ;;  %2078 = vmatpush1.bf16.msra.mxu0 %v3676_v7  ;;  %v3718_v55 = vpack.c.bf16 %v3636_v34, %v3635_v41  ;;  %v3720_v7 = vpack.c.bf16 %v3638_v0, %v3637_v63  ;;  %v3725_v34 = vld [vmem:[#allocation84_spill] sm:$0xff]  ;;  %v3726_v41 = vpack.c.bf16 %v2847_v28, %v2841_v33  ;;  %v3727_v0 = vld [vmem:[#allocation86_spill] sm:$0xff]  ;;  %v3731_v51 = vld [vmem:[#allocation93_spill] sm:$0xff]  ;;  %v1580_v28 = vlaneseq }
  0xd9   : > { %1888 = vmatprep.subr.bf16.mxu1 %v3677_v17  ;;  %2080 = vmatprep.subr.bf16.mxu0 %v3678_v21  ;;  %v3728_v63 = vpack.c.bf16 %v2858_v56, %v2852_v23 }
  0xda   : > { %v1581_v33 = vshrl.u32 %v1580_v28, 7 }
  0xdc   : > { %1890 = vmatpush1.bf16.msra.mxu1 %v3681_v24  ;;  %2082 = vmatpush1.bf16.msra.mxu0 %v3682_v27  ;;  %v1582_v15 = vsub.s32 0, %v1581_v33  ;;  %v2180_v27 = vld [vmem:[%s2423_s11 + $0x8] sm:$0xff]  ;;  %s1617_s11 = sld [smem:[#allocation2]] }
  0xdd   : > { %1892 = vmatprep.subr.bf16.mxu1 %v3685_v11  ;;  %2084 = vmatprep.subr.bf16.mxu0 %v3686_v18 }
  0xe0   : > { %1894 = vmatpush1.bf16.msra.mxu1 %v3689_v4  ;;  %2086 = vmatpush1.bf16.msra.mxu0 %v3690_v29 }
  0xe1   : > { %1896 = vmatprep.subr.bf16.mxu1 %v3692_v37  ;;  %2088 = vmatprep.subr.bf16.mxu0 %v3693_v1 }
  0xe4   : > { %1898 = vmatpush1.bf16.msra.mxu1 %v3695_v57  ;;  %2090 = vmatpush1.bf16.msra.mxu0 %v3696_v54 }
  0xe5   : > { %1900 = vmatprep.subr.bf16.mxu1 %v3699_v62  ;;  %2092 = vmatprep.subr.bf16.mxu0 %v3700_v39 }
  0xe8   : > { %1902 = vmatpush1.bf16.msra.mxu1 %v3703_v14  ;;  %2094 = vmatpush1.bf16.msra.mxu0 %v3704_v49 }
  0xe9   : > { %1904 = vmatprep.subr.bf16.mxu1 %v3706_v43  ;;  %2096 = vmatprep.subr.bf16.mxu0 %v3707_v19  ;;  %v1621_v19 = vstv %s1617_s11 }
  0xec   : > { %1906 = vmatpush1.bf16.msra.mxu1 %v3709_v45  ;;  %2098 = vmatpush1.bf16.msra.mxu0 %v3710_v48  ;;  %v1624_v48 = vstv %s1618_s10 }
  0xed   : > { %1908 = vmatprep.subr.bf16.mxu1 %v3712_v59  ;;  %2100 = vmatprep.subr.bf16.mxu0 %v3713_v5 }
  0xf0   : > { %1910 = vmatpush1.bf16.msra.mxu1 %v3714_v9  ;;  %2102 = vmatpush1.bf16.msra.mxu0 %v3715_v31 }
  0xf1   : > { %1912 = vmatprep.subr.bf16.mxu1 %v3716_v60  ;;  %2104 = vmatprep.subr.bf16.mxu0 %v3717_v58 }
  0xf4   : > { %1914 = vmatpush1.bf16.msra.mxu1 %v3718_v55  ;;  %2106 = vmatpush1.bf16.msra.mxu0 %v3719_v50 }
  0xf5   : > { %1916 = vmatprep.subr.bf16.mxu1 %v3720_v7  ;;  %2108 = vmatprep.subr.bf16.mxu0 %v3721_v61 }
  0xf8   : > { %1918 = vmatpush1.bf16.msra.mxu1 %v3722_v10  ;;  %2110 = vmatpush1.bf16.msra.mxu0 %v3723_v52 }
  0xf9   : > { %1920 = vmatprep.subr.bf16.mxu1 %v3724_v46  ;;  %2112 = vmatprep.subr.bf16.mxu0 %v3725_v34 }
  0xfc   : > { %1922 = vmatpush1.bf16.msra.mxu1 %v3726_v41  ;;  %2114 = vmatpush1.bf16.msra.mxu0 %v3727_v0 }
  0xfd   : > { %1924 = vmatprep.subr.bf16.mxu1 %v3728_v63  ;;  %2116 = vmatprep.subr.bf16.mxu0 %v3729_v40 }
 0x100   : > { %1926 = vmatpush1.bf16.msra.mxu1 %v1925_v38  ;;  %2118 = vmatpush1.bf16.msra.mxu0 %v3730_v16 }
 0x103   : > { %1031 = vmatmul.mubr.f32.vlgmr.msra.gmra.mrb[0].mxu1 %v3731_v51  ;;  %1574 = vmatmul.mubr.f32.vlgmr.msra.gmra.mrb[0].mxu0 %v3654_v12 }
 0x1d6   : > { %v1032_v17 = vpop.f32.mrb[0].mxu1  ;;  %v1575_v23 = vpop.f32.mrb[0].mxu0 }
 0x1d7   : > { %v2119_v56 = vadd.f32 %v1575_v23, %v1032_v17  ;;  %v1034_v21 = vpop.f32.mrb[1].mxu1  ;;  %v1577_v22 = vpop.f32.mrb[1].mxu0 }
 0x1d8   : > { %v2120_v26 = vadd.f32 %v1577_v22, %v1034_v21 }
 0x1d9   : > { %v1583_v24 = vrot.slane %v2119_v56, %v1582_v15 }
 0x1da   : > { %v1587_v35 = vrot.slane %v2120_v26, %v1582_v15 }
 0x1db   : > { %v1588_v38 = vmul.f32 %v2179_v8, %v1583_v24 }
 0x1dc   : > { %v1589_v13 = vmul.f32 %v2180_v27, %v1587_v35 }
 0x1de   : > { %v1590_v2 = vadd.f32 %v1589_v13, %v1588_v38 }
 0x1e0   : > { %1591 = vadd.xlane.f32.xlu0 %v1590_v2 }
 0x26d   : > { %v1592_v11 = vpop.xlane.xlu0 %1591 }
 0x26e   : > { %v1593_v18 = vrot.slane %v1592_v11, 4 }
 0x270   : > { %v1594_v12 = vadd.f32 %v1593_v18, %v1592_v11 }
 0x272   : > { %v1595_v6 = vrot.slane %v1594_v12, 2 }
 0x274   : > { %v1596_v3 = vadd.f32 %v1595_v6, %v1594_v12 }
 0x276   : > { %v1597_v4 = vrot.slane %v1596_v3, 1 }
 0x278   : > { %v1598_v29 = vadd.f32 %v1597_v4, %v1596_v3 }
 0x27a   : > { %v1600_v25 = vmul.f32 0.125, %v1598_v29 }
 0x27c   : > { %v1601_v37 = vsub.f32 %v1592_v11, %v1600_v25 }
 0x27e   : > { %v1602_v1 = vmul.f32 %v1601_v37, %v1601_v37 }
 0x280   : > { %v1603_v42 = vrot.slane %v1602_v1, 4 }
 0x282   : > { %v1604_v57 = vadd.f32 %v1603_v42, %v1602_v1 }
 0x284   : > { %v1605_v54 = vrot.slane %v1604_v57, 2 }
 0x286   : > { %v1606_v20 = vadd.f32 %v1605_v54, %v1604_v57 }
 0x288   : > { %v1607_v47 = vrot.slane %v1606_v20, 1 }
 0x28a   : > { %v1608_v62 = vadd.f32 %v1607_v47, %v1606_v20 }
 0x28c   : > { %v1609_v39 = vmul.f32 0.125, %v1608_v62 }
 0x28e   : > { %2175 = vrsqrt.f32 %v1609_v39  ;;  %vm1612_vm0 = vcmp.eq.f32.partialorder %v1609_v39, inf  ;;  %v1615_v14 = vand.u32 2147483648, %v1609_v39  ;;  %vm1614_vm1 = vcmp.eq.f32.partialorder %v1609_v39, 0.0 }
 0x298   : > { %v2176_v36 = vpop.eup %2175 }
 0x299   : > { %v1611_v32 = vmul.f32 %v2176_v36, %v1609_v39 }
 0x29b   : > { %v1613_v49 = vsel %vm1612_vm0, %v1609_v39, %v1611_v32 }
 0x29c   : > { %v1616_v30 = vsel %vm1614_vm1, %v1615_v14, %v1613_v49 }
 0x29d   : > { %v1619_v43 = vadd.f32 1e-05, %v1616_v30 }
 0x29f   : > { %2177 = vrcp.f32 %v1619_v43 }
 0x2a9   : > { %v2178_v44 = vpop.eup %2177 }
 0x2aa   : > { %v1622_v45 = vmul.f32 %v2178_v44, %v1621_v19 }
 0x2ac   : > { %v1623_v53 = vmul.f32 %v1622_v45, %v1600_v25  ;;  %v1626_v5 = vmul.f32 %v1622_v45, %v1592_v11 }
 0x2ae   : > { %v1625_v59 = vsub.f32 %v1624_v48, %v1623_v53 }
 0x2b0   : > { %v1627_v9 = vadd.f32 %v1626_v5, %v1625_v59 }
 0x2b2   : > { %v1628_v31 = vmul.f32 %v1627_v9, %v1583_v24  ;;  %v1629_v60 = vmul.f32 %v1627_v9, %v1587_v35 }
 0x2b4   : > { %v1630_v58 = vadd.f32 %v2179_v8, %v1628_v31  ;;  %v1631_v55 = vadd.f32 %v2180_v27, %v1629_v60 }
 0x2b6   : > { %1632 = vst [vmem:[%s215_s13] sm:$0xff] %v1630_v58  ;;  %1633 = vst [vmem:[%s215_s13 + $0x8] sm:$0xff] %v1631_v55 }
 0x2b7   : > { %2224 = shalt.err (!%p2221_p4)
}
 0x2b8   : > { %s2225_s7 = scalar_lea.hbm %s3301_s17, 256  ;;  %s2229_s27 = scalar_lea.hbm %s3349_s4, 512 }
 0x2b9   : > { %p2226_p5 = scmp.ne.s32.totalorder %s3301_s17, %s2225_s7  ;;  %p2230_p0 = scmp.lt.u32.totalorder %s3301_s17, %s3349_s4 }
 0x2ba   : > { %p2231_p1 = scmp.lt.u32.totalorder %s2229_s27, %s2225_s7  ;;  %p2233_p6 = scmp.lt.u32.totalorder %s2225_s7, %s3301_s17 }
 0x2bb   : > { %p2227_p8 = pnand %p2226_p5, %p3732_p11 }
 0x2bc   : > { %p2232_p3 = por %p2231_p1, %p2230_p0 }
 0x2bd   : > { %p2228_p9 = pneg %p2227_p8 }
 0x2be   : > { %p2234_p12 = por %p2233_p6, %p2232_p3 }
 0x2c0   : > { %p2235_p13 = pnand %p2234_p12, %p2228_p9 }
 0x2c2   : > { %2238 = shalt.err (!%p2235_p13)
}
 0x2c3   : > { %2131 = dma.vmem_to_hbm [thread:$0]  (%p3732_p11), %s3303_s14, 256, %s3301_s17, %s1635_s0  }
 0x2c4 PF: > { %s1661_s9 = sand.u32 1, %s2265_s19   ;;  %p3733_p7 = scmp.ne.s32.totalorder %s3484_s30, 0 }
 0x2c5   : > { %p3734_p10 = scmp.ge.s32.totalorder %s2277_s22, 2  ;;  %s1662_s11 = scalar_lea.sflag [#allocation6], %s1661_s9 }
 0x2c7   : > { %p2138_p2 = pnand %p3734_p10, %p3733_p7 }
 0x2c9   : > { %2260 = dma.done.wait (!%p2138_p2), %s1662_s11, 256  }
 0x2ca   : > { %2262 = vsyncadd (!%p2138_p2), %s1662_s11, 4294967040  ;;  %p19_p4 = scmp.ge.s32.totalorder %s2337_s23, 4   ;;  %s3735_s19 = smov %s2269_s20 }
 0x2cb   : > { %s3736_s20 = smov %s2273_s21  ;;  %s3737_s21 = smov %s2349_s26 }
 0x2cc   : > { %s3738_s22 = smov %s2337_s23  ;;  %21 = sbr.rel (!%p19_p4) target bundleno = 8 (0x8), region = 81 }
 0x2d3   :  { %1667 = vsyncpa [#allocation5], 1 }
 0x2d4   :  { %1669 = vsyncpa [#allocation5 + $0x1], 1 }
 0x2d5   :  { %1670 = vsyncpa [#allocation6], 1 }
 0x2d6   :  { %1672 = vsyncpa [#allocation6 + $0x1], 1 }

</bundles_post_ra>
